<compile_context>
chip_gen: v6e
topology: v6e:2x2x1
jax: 0.10.0
libtpu: 0.0.40
codegen_flags: <defaults>
</compile_context>

<pallas_src>
import math

import jax
import jax.numpy as jnp
from jax.experimental import pallas as pl
from jax.experimental.pallas import tpu as pltpu


def _round_up(n, m):
    return ((n + m - 1) // m) * m


def _softplus(x):
    # log1p(exp(x)) with an overflow guard: identical to the PyTorch reference
    # for x <~ 88, and returns x (instead of inf) for very large x.
    return jnp.where(x > 20.0, x, jnp.log1p(jnp.exp(jnp.minimum(x, 20.0))))


def _softplus_beta10(x):
    # F.softplus(x, beta=10) with PyTorch's threshold=20 behavior.
    z = 10.0 * x
    return jnp.where(z > 20.0, x, jnp.log1p(jnp.exp(jnp.minimum(z, 20.0))) / 10.0)


def _make_prepare_kernel(o_real, in_real):
    """Sampling + squaring + masked KL, executed once over padded params."""

    def prepare_kernel(wmu_ref, wrho_ref, wnoise_ref,
                       bmu_ref, brho_ref, bnoise_ref,
                       w2_ref, b2_ref, kl_ref):
        wmu = wmu_ref[...]          # (O_p, IN_p)
        wrho = wrho_ref[...]        # (O_p, IN_p)
        bmu = bmu_ref[...]          # (1, O_p)
        brho = brho_ref[...]        # (1, O_p)

        # weight_sigma = log1p(exp(weight_rho))  (softplus, beta=1)
        wsig = _softplus(wrho)
        bsig = _softplus(brho)

        # Reparameterized sample: mu + softplus(sigma, beta=10) * eps
        w = wmu + _softplus_beta10(wsig) * wnoise_ref[...]
        b = bmu + _softplus_beta10(bsig) * bnoise_ref[...]

        # F.linear uses weight**2 / bias**2.  Padded rows/cols have mu=0,
        # noise=0 => w=0 => w2=0, so the padded output columns stay zero.
        w2_ref[...] = (w * w).astype(w2_ref.dtype)
        b2_ref[...] = (b * b).astype(b2_ref.dtype)

        # KL( N(mu, sigma) || N(0, prior_var=1) ) per element, masked to the
        # real (o_real, in_real) extent so the zero-padding does not leak in.
        op, ip = wmu.shape
        row = jax.lax.broadcasted_iota(jnp.int32, (op, ip), 0)
        col = jax.lax.broadcasted_iota(jnp.int32, (op, ip), 1)
        wmask = (row < o_real) & (col < in_real)
        klw = jnp.sum(jnp.where(
            wmask, -jnp.log(wsig) + 0.5 * (wsig * wsig + wmu * wmu) - 0.5, 0.0))

        bcol = jax.lax.broadcasted_iota(jnp.int32, bmu.shape, 1)
        bmask = bcol < o_real
        klb = jnp.sum(jnp.where(
            bmask, -jnp.log(bsig) + 0.5 * (bsig * bsig + bmu * bmu) - 0.5, 0.0))

        kl_ref[...] = jnp.reshape(klw + klb, (1, 1))

    return prepare_kernel


def _matmul_kernel(x_ref, w2_ref, b2_ref, out_ref):
    # Contract x's IN axis with w2's IN axis directly (no transpose of w2).
    acc = jax.lax.dot_general(
        x_ref[...], w2_ref[...],
        dimension_numbers=(((1,), (1,)), ((), ())),
        preferred_element_type=jnp.float32)
    out_ref[...] = (acc + b2_ref[...]).astype(out_ref.dtype)


def bayesian_linear_positive(x, weight_mu, weight_rho, bias_mu, bias_rho,
                             weight_noise, bias_noise, *, max_block_b=512):
    """Returns (output [B, O], kl scalar), matching the PyTorch forward()."""
    B, IN = x.shape
    O = weight_mu.shape[0]
    f32 = jnp.float32

    # 128-aligned padded extents (lane-dense stores, full-width MXU tiles).
    IN_p = _round_up(IN, 128)
    O_p = _round_up(O, 128)

    # Batch tiling: whole (8-aligned) batch if it fits in one big tile,
    # otherwise max_block_b-row tiles with the batch padded up to a multiple.
    B8 = _round_up(B, 8)
    if B8 <= max_block_b:
        block_b = B8
        B_p = B8
    else:
        block_b = max_block_b
        B_p = _round_up(B, block_b)

    def pad_to(a, shape):
        return jnp.pad(a, tuple((0, s - d) for d, s in zip(a.shape, shape)))

    wmu_p = pad_to(weight_mu.astype(f32), (O_p, IN_p))
    wrho_p = pad_to(weight_rho.astype(f32), (O_p, IN_p))
    wn_p = pad_to(weight_noise.astype(f32), (O_p, IN_p))
    bmu_p = pad_to(bias_mu.reshape(1, O).astype(f32), (1, O_p))
    brho_p = pad_to(bias_rho.reshape(1, O).astype(f32), (1, O_p))
    bn_p = pad_to(bias_noise.reshape(1, O).astype(f32), (1, O_p))
    x_p = pad_to(x.astype(f32), (B_p, IN_p))

    # ---- Kernel 1: sample + square + KL, once. ----
    w2, b2, kl = pl.pallas_call(
        _make_prepare_kernel(O, IN),
        out_shape=(jax.ShapeDtypeStruct((O_p, IN_p), f32),
                   jax.ShapeDtypeStruct((1, O_p), f32),
                   jax.ShapeDtypeStruct((1, 1), f32)),
        grid_spec=pltpu.PrefetchScalarGridSpec(
            num_scalar_prefetch=0,
            grid=(1,),
            in_specs=[
                pl.BlockSpec((O_p, IN_p), lambda i: (0, 0)),
                pl.BlockSpec((O_p, IN_p), lambda i: (0, 0)),
                pl.BlockSpec((O_p, IN_p), lambda i: (0, 0)),
                pl.BlockSpec((1, O_p), lambda i: (0, 0)),
                pl.BlockSpec((1, O_p), lambda i: (0, 0)),
                pl.BlockSpec((1, O_p), lambda i: (0, 0)),
            ],
            out_specs=(
                pl.BlockSpec((O_p, IN_p), lambda i: (0, 0)),
                pl.BlockSpec((1, O_p), lambda i: (0, 0)),
                pl.BlockSpec((1, 1), lambda i: (0, 0)),
            ),
        ),
        compiler_params=pltpu.CompilerParams(
            dimension_semantics=("arbitrary",)),
    )(wmu_p, wrho_p, wn_p, bmu_p, brho_p, bn_p)

    # ---- Kernel 2: batch-tiled matmul, megacore-parallel over batch. ----
    vmem_est = 4 * (O_p * IN_p + 2 * block_b * IN_p + 2 * block_b * O_p
                    + 4 * O_p) + (2 << 20)
    vmem_limit = min(64 * 1024 * 1024, max(vmem_est, 32 * 1024 * 1024))

    out_p = pl.pallas_call(
        _matmul_kernel,
        out_shape=jax.ShapeDtypeStruct((B_p, O_p), x.dtype),
        grid_spec=pltpu.PrefetchScalarGridSpec(
            num_scalar_prefetch=0,
            grid=(B_p // block_b,),
            in_specs=[
                pl.BlockSpec((block_b, IN_p), lambda i: (i, 0)),  # x tile
                pl.BlockSpec((O_p, IN_p), lambda i: (0, 0)),      # w2 (resident)
                pl.BlockSpec((1, O_p), lambda i: (0, 0)),         # b2 (resident)
            ],
            out_specs=pl.BlockSpec((block_b, O_p), lambda i: (i, 0)),
        ),
        compiler_params=pltpu.CompilerParams(
            dimension_semantics=("parallel",),
            vmem_limit_bytes=vmem_limit),
    )(x_p, w2, b2)

    return out_p[:B, :O], kl[0, 0]


if __name__ == "__main__":
    key = jax.random.PRNGKey(0)
    B, IN, O = 16, 32, 64
    k_x, k_wmu, k_bmu, k_wn, k_bn = jax.random.split(key, 5)

    # Deterministic parameter init mirroring reset_parameters():
    #   kaiming_uniform_(a=sqrt(5)) -> U(-1/sqrt(fan_in), 1/sqrt(fan_in))
    #   bias: U(-1/sqrt(fan_in), 1/sqrt(fan_in)); rho = -5 constant.
    fan_in = IN
    bound = 1.0 / math.sqrt(fan_in)
    weight_mu = jax.random.uniform(k_wmu, (O, IN), jnp.float32, -bound, bound)
    bias_mu = jax.random.uniform(k_bmu, (O,), jnp.float32, -bound, bound)
    weight_rho = jnp.full((O, IN), -5.0, dtype=jnp.float32)
    bias_rho = jnp.full((O,), -5.0, dtype=jnp.float32)

    x = jax.random.normal(k_x, (B, IN), dtype=jnp.float32)
    # Deterministic stand-in for torch.randn_like() reparameterization noise.
    # TODO(synk): in-kernel pltpu.prng_* sampling could replace the host noise.
    weight_noise = jax.random.normal(k_wn, (O, IN), dtype=jnp.float32)
    bias_noise = jax.random.normal(k_bn, (O,), dtype=jnp.float32)

    out, kl = bayesian_linear_positive(x, weight_mu, weight_rho, bias_mu,
                                       bias_rho, weight_noise, bias_noise)
    jax.block_until_ready((out, kl))

    # Plain-JAX reference of the same forward semantics (sanity check).
    wsig = jnp.log1p(jnp.exp(weight_rho))
    bsig = jnp.log1p(jnp.exp(bias_rho))
    w = weight_mu + _softplus_beta10(wsig) * weight_noise
    b = bias_mu + _softplus_beta10(bsig) * bias_noise
    ref_out = x @ (w ** 2).T + b ** 2
    ref_kl = (jnp.sum(-jnp.log(wsig) + 0.5 * (wsig ** 2 + weight_mu ** 2) - 0.5)
              + jnp.sum(-jnp.log(bsig) + 0.5 * (bsig ** 2 + bias_mu ** 2) - 0.5))
    assert jnp.allclose(out, ref_out, rtol=1e-5, atol=1e-5)
    assert jnp.allclose(kl, ref_kl, rtol=1e-5, atol=1e-5)

    print("KERNEL_OK")
</pallas_src>

<mosaic_0001>
module attributes {stable_mosaic.version = 11 : i64} {
  func.func @prepare_kernel(%arg0: i32, %arg1: memref<128x128xf32, #tpu.memory_space<vmem>>, %arg2: memref<128x128xf32, #tpu.memory_space<vmem>>, %arg3: memref<128x128xf32, #tpu.memory_space<vmem>>, %arg4: memref<1x128xf32, #tpu.memory_space<vmem>>, %arg5: memref<1x128xf32, #tpu.memory_space<vmem>>, %arg6: memref<1x128xf32, #tpu.memory_space<vmem>>, %arg7: memref<128x128xf32, #tpu.memory_space<vmem>>, %arg8: memref<1x128xf32, #tpu.memory_space<vmem>>, %arg9: memref<1x1xf32, #tpu.memory_space<vmem>>) attributes {dimension_semantics = [#tpu.dimension_semantics<arbitrary>], iteration_bounds = array<i64: 1>, scalar_prefetch = 0 : i64, scratch_operands = 0 : i64, tpu.core_type = #tpu.core_type<tc>, window_params = [{pipeline_mode = #tpu.pipeline_mode<synchronous>, transform_indices = @transform_0, window_bounds = array<i64: 128, 128>}, {pipeline_mode = #tpu.pipeline_mode<synchronous>, transform_indices = @transform_1, window_bounds = array<i64: 128, 128>}, {pipeline_mode = #tpu.pipeline_mode<synchronous>, transform_indices = @transform_2, window_bounds = array<i64: 128, 128>}, {pipeline_mode = #tpu.pipeline_mode<synchronous>, transform_indices = @transform_3, window_bounds = array<i64: 1, 128>}, {pipeline_mode = #tpu.pipeline_mode<synchronous>, transform_indices = @transform_4, window_bounds = array<i64: 1, 128>}, {pipeline_mode = #tpu.pipeline_mode<synchronous>, transform_indices = @transform_5, window_bounds = array<i64: 1, 128>}, {pipeline_mode = #tpu.pipeline_mode<synchronous>, transform_indices = @transform_6, window_bounds = array<i64: 128, 128>}, {pipeline_mode = #tpu.pipeline_mode<synchronous>, transform_indices = @transform_7, window_bounds = array<i64: 1, 128>}, {pipeline_mode = #tpu.pipeline_mode<synchronous>, transform_indices = @transform_8, window_bounds = array<i64: 1, 1>}]} {
    %c0 = arith.constant 0 : index
    %c0_0 = arith.constant 0 : index
    %0 = vector.load %arg1[%c0, %c0_0] : memref<128x128xf32, #tpu.memory_space<vmem>>, vector<128x128xf32>
    %c0_1 = arith.constant 0 : index
    %c0_2 = arith.constant 0 : index
    %1 = vector.load %arg2[%c0_1, %c0_2] : memref<128x128xf32, #tpu.memory_space<vmem>>, vector<128x128xf32>
    %c0_3 = arith.constant 0 : index
    %c0_4 = arith.constant 0 : index
    %2 = vector.load %arg4[%c0_3, %c0_4] : memref<1x128xf32, #tpu.memory_space<vmem>>, vector<1x128xf32>
    %c0_5 = arith.constant 0 : index
    %c0_6 = arith.constant 0 : index
    %3 = vector.load %arg5[%c0_5, %c0_6] : memref<1x128xf32, #tpu.memory_space<vmem>>, vector<1x128xf32>
    %cst = arith.constant 2.000000e+01 : f32
    %4 = vector.broadcast %cst : f32 to vector<128x128xf32>
    %5 = arith.cmpf ogt, %1, %4 : vector<128x128xf32>
    %cst_7 = arith.constant 2.000000e+01 : f32
    %6 = vector.broadcast %cst_7 : f32 to vector<128x128xf32>
    %7 = arith.minimumf %1, %6 : vector<128x128xf32>
    %8 = math.exp %7 : vector<128x128xf32>
    %9 = math.log1p %8 : vector<128x128xf32>
    %10 = arith.select %5, %1, %9 : vector<128x128xi1>, vector<128x128xf32>
    %cst_8 = arith.constant 2.000000e+01 : f32
    %11 = vector.broadcast %cst_8 : f32 to vector<1x128xf32>
    %12 = arith.cmpf ogt, %3, %11 : vector<1x128xf32>
    %cst_9 = arith.constant 2.000000e+01 : f32
    %13 = vector.broadcast %cst_9 : f32 to vector<1x128xf32>
    %14 = arith.minimumf %3, %13 : vector<1x128xf32>
    %15 = math.exp %14 : vector<1x128xf32>
    %16 = math.log1p %15 : vector<1x128xf32>
    %17 = arith.select %12, %3, %16 : vector<1x128xi1>, vector<1x128xf32>
    %cst_10 = arith.constant 1.000000e+01 : f32
    %18 = vector.broadcast %cst_10 : f32 to vector<128x128xf32>
    %19 = arith.mulf %18, %10 : vector<128x128xf32>
    %cst_11 = arith.constant 2.000000e+01 : f32
    %20 = vector.broadcast %cst_11 : f32 to vector<128x128xf32>
    %21 = arith.cmpf ogt, %19, %20 : vector<128x128xf32>
    %cst_12 = arith.constant 2.000000e+01 : f32
    %22 = vector.broadcast %cst_12 : f32 to vector<128x128xf32>
    %23 = arith.minimumf %19, %22 : vector<128x128xf32>
    %24 = math.exp %23 : vector<128x128xf32>
    %25 = math.log1p %24 : vector<128x128xf32>
    %cst_13 = arith.constant 1.000000e+01 : f32
    %26 = vector.broadcast %cst_13 : f32 to vector<128x128xf32>
    %27 = arith.divf %25, %26 : vector<128x128xf32>
    %28 = arith.select %21, %10, %27 : vector<128x128xi1>, vector<128x128xf32>
    %c0_14 = arith.constant 0 : index
    %c0_15 = arith.constant 0 : index
    %29 = vector.load %arg3[%c0_14, %c0_15] : memref<128x128xf32, #tpu.memory_space<vmem>>, vector<128x128xf32>
    %30 = arith.mulf %28, %29 : vector<128x128xf32>
    %31 = arith.addf %0, %30 : vector<128x128xf32>
    %cst_16 = arith.constant 1.000000e+01 : f32
    %32 = vector.broadcast %cst_16 : f32 to vector<1x128xf32>
    %33 = arith.mulf %32, %17 : vector<1x128xf32>
    %cst_17 = arith.constant 2.000000e+01 : f32
    %34 = vector.broadcast %cst_17 : f32 to vector<1x128xf32>
    %35 = arith.cmpf ogt, %33, %34 : vector<1x128xf32>
    %cst_18 = arith.constant 2.000000e+01 : f32
    %36 = vector.broadcast %cst_18 : f32 to vector<1x128xf32>
    %37 = arith.minimumf %33, %36 : vector<1x128xf32>
    %38 = math.exp %37 : vector<1x128xf32>
    %39 = math.log1p %38 : vector<1x128xf32>
    %cst_19 = arith.constant 1.000000e+01 : f32
    %40 = vector.broadcast %cst_19 : f32 to vector<1x128xf32>
    %41 = arith.divf %39, %40 : vector<1x128xf32>
    %42 = arith.select %35, %17, %41 : vector<1x128xi1>, vector<1x128xf32>
    %c0_20 = arith.constant 0 : index
    %c0_21 = arith.constant 0 : index
    %43 = vector.load %arg6[%c0_20, %c0_21] : memref<1x128xf32, #tpu.memory_space<vmem>>, vector<1x128xf32>
    %44 = arith.mulf %42, %43 : vector<1x128xf32>
    %45 = arith.addf %2, %44 : vector<1x128xf32>
    %46 = arith.mulf %31, %31 : vector<128x128xf32>
    %c0_22 = arith.constant 0 : index
    %c0_23 = arith.constant 0 : index
    %47 = vector.load %arg7[%c0_22, %c0_23] : memref<128x128xf32, #tpu.memory_space<vmem>>, vector<128x128xf32>
    tpu.vector_store %arg7[%c0_22, %c0_23], %46 {strides = array<i32>} : memref<128x128xf32, #tpu.memory_space<vmem>>, vector<128x128xf32>,
    %48 = arith.mulf %45, %45 : vector<1x128xf32>
    %c0_24 = arith.constant 0 : index
    %c0_25 = arith.constant 0 : index
    %49 = vector.load %arg8[%c0_24, %c0_25] : memref<1x128xf32, #tpu.memory_space<vmem>>, vector<1x128xf32>
    tpu.vector_store %arg8[%c0_24, %c0_25], %48 {strides = array<i32>} : memref<1x128xf32, #tpu.memory_space<vmem>>, vector<1x128xf32>,
    %50 = tpu.iota {dimensions = array<i32: 0>} : vector<128x128xi32>
    %51 = tpu.iota {dimensions = array<i32: 1>} : vector<128x128xi32>
    %c64_i32 = arith.constant 64 : i32
    %52 = vector.broadcast %c64_i32 : i32 to vector<128x128xi32>
    %53 = arith.cmpi slt, %50, %52 : vector<128x128xi32>
    %c32_i32 = arith.constant 32 : i32
    %54 = vector.broadcast %c32_i32 : i32 to vector<128x128xi32>
    %55 = arith.cmpi slt, %51, %54 : vector<128x128xi32>
    %56 = arith.andi %53, %55 : vector<128x128xi1>
    %57 = math.log %10 : vector<128x128xf32>
    %cst_26 = arith.constant 0.000000e+00 : f32
    %58 = vector.broadcast %cst_26 : f32 to vector<128x128xf32>
    %59 = arith.subf %58, %57 : vector<128x128xf32>
    %60 = arith.mulf %10, %10 : vector<128x128xf32>
    %61 = arith.mulf %0, %0 : vector<128x128xf32>
    %62 = arith.addf %60, %61 : vector<128x128xf32>
    %cst_27 = arith.constant 5.000000e-01 : f32
    %63 = vector.broadcast %cst_27 : f32 to vector<128x128xf32>
    %64 = arith.mulf %63, %62 : vector<128x128xf32>
    %65 = arith.addf %59, %64 : vector<128x128xf32>
    %cst_28 = arith.constant 5.000000e-01 : f32
    %66 = vector.broadcast %cst_28 : f32 to vector<128x128xf32>
    %67 = arith.subf %65, %66 : vector<128x128xf32>
    %cst_29 = arith.constant 0.000000e+00 : f32
    %68 = vector.broadcast %cst_29 : f32 to vector<128x128xf32>
    %69 = arith.select %56, %67, %68 : vector<128x128xi1>, vector<128x128xf32>
    %70 = vector.shape_cast %69 : vector<128x128xf32> to vector<1x128x128xf32>
    %cst_30 = arith.constant dense<0.000000e+00> : vector<1xf32>
    %71 = vector.multi_reduction <add>, %70, %cst_30 [1, 2] : vector<1x128x128xf32> to vector<1xf32>
    %72 = vector.shape_cast %71 : vector<1xf32> to vector<1x1x1xf32>
    %73 = vector.extract %72[0, 0, 0] : f32 from vector<1x1x1xf32>
    %74 = tpu.iota {dimensions = array<i32: 1>} : vector<1x128xi32>
    %c64_i32_31 = arith.constant 64 : i32
    %75 = vector.broadcast %c64_i32_31 : i32 to vector<1x128xi32>
    %76 = arith.cmpi slt, %74, %75 : vector<1x128xi32>
    %77 = math.log %17 : vector<1x128xf32>
    %cst_32 = arith.constant 0.000000e+00 : f32
    %78 = vector.broadcast %cst_32 : f32 to vector<1x128xf32>
    %79 = arith.subf %78, %77 : vector<1x128xf32>
    %80 = arith.mulf %17, %17 : vector<1x128xf32>
    %81 = arith.mulf %2, %2 : vector<1x128xf32>
    %82 = arith.addf %80, %81 : vector<1x128xf32>
    %cst_33 = arith.constant 5.000000e-01 : f32
    %83 = vector.broadcast %cst_33 : f32 to vector<1x128xf32>
    %84 = arith.mulf %83, %82 : vector<1x128xf32>
    %85 = arith.addf %79, %84 : vector<1x128xf32>
    %cst_34 = arith.constant 5.000000e-01 : f32
    %86 = vector.broadcast %cst_34 : f32 to vector<1x128xf32>
    %87 = arith.subf %85, %86 : vector<1x128xf32>
    %cst_35 = arith.constant 0.000000e+00 : f32
    %88 = vector.broadcast %cst_35 : f32 to vector<1x128xf32>
    %89 = arith.select %76, %87, %88 : vector<1x128xi1>, vector<1x128xf32>
    %90 = vector.shape_cast %89 : vector<1x128xf32> to vector<1x1x128xf32>
    %cst_36 = arith.constant dense<0.000000e+00> : vector<1xf32>
    %91 = vector.multi_reduction <add>, %90, %cst_36 [1, 2] : vector<1x1x128xf32> to vector<1xf32>
    %92 = vector.shape_cast %91 : vector<1xf32> to vector<1x1x1xf32>
    %93 = vector.extract %92[0, 0, 0] : f32 from vector<1x1x1xf32>
    %94 = arith.addf %73, %93 : f32
    %95 = vector.broadcast %94 : f32 to vector<1x1xf32>
    %c0_37 = arith.constant 0 : index
    %c0_38 = arith.constant 0 : index
    %96 = vector.load %arg9[%c0_37, %c0_38] : memref<1x1xf32, #tpu.memory_space<vmem>>, vector<1x1xf32>
    tpu.vector_store %arg9[%c0_37, %c0_38], %95 {strides = array<i32>} : memref<1x1xf32, #tpu.memory_space<vmem>>, vector<1x1xf32>,
    return
  }
  func.func @transform_0(%arg0: i32) -> (i32, i32) {
    %c0_i32 = arith.constant 0 : i32
    %c0_i32_0 = arith.constant 0 : i32
    %c0_i32_1 = arith.constant 0 : i32
    return %c0_i32, %c0_i32_0 : i32, i32
  }
  func.func @transform_1(%arg0: i32) -> (i32, i32) {
    %c0_i32 = arith.constant 0 : i32
    %c0_i32_0 = arith.constant 0 : i32
    %c0_i32_1 = arith.constant 0 : i32
    return %c0_i32, %c0_i32_0 : i32, i32
  }
  func.func @transform_2(%arg0: i32) -> (i32, i32) {
    %c0_i32 = arith.constant 0 : i32
    %c0_i32_0 = arith.constant 0 : i32
    %c0_i32_1 = arith.constant 0 : i32
    return %c0_i32, %c0_i32_0 : i32, i32
  }
  func.func @transform_3(%arg0: i32) -> (i32, i32) {
    %c0_i32 = arith.constant 0 : i32
    %c0_i32_0 = arith.constant 0 : i32
    %c0_i32_1 = arith.constant 0 : i32
    return %c0_i32, %c0_i32_0 : i32, i32
  }
  func.func @transform_4(%arg0: i32) -> (i32, i32) {
    %c0_i32 = arith.constant 0 : i32
    %c0_i32_0 = arith.constant 0 : i32
    %c0_i32_1 = arith.constant 0 : i32
    return %c0_i32, %c0_i32_0 : i32, i32
  }
  func.func @transform_5(%arg0: i32) -> (i32, i32) {
    %c0_i32 = arith.constant 0 : i32
    %c0_i32_0 = arith.constant 0 : i32
    %c0_i32_1 = arith.constant 0 : i32
    return %c0_i32, %c0_i32_0 : i32, i32
  }
  func.func @transform_6(%arg0: i32) -> (i32, i32) {
    %c0_i32 = arith.constant 0 : i32
    %c0_i32_0 = arith.constant 0 : i32
    %c0_i32_1 = arith.constant 0 : i32
    return %c0_i32, %c0_i32_0 : i32, i32
  }
  func.func @transform_7(%arg0: i32) -> (i32, i32) {
    %c0_i32 = arith.constant 0 : i32
    %c0_i32_0 = arith.constant 0 : i32
    %c0_i32_1 = arith.constant 0 : i32
    return %c0_i32, %c0_i32_0 : i32, i32
  }
  func.func @transform_8(%arg0: i32) -> (i32, i32) {
    %c0_i32 = arith.constant 0 : i32
    %c0_i32_0 = arith.constant 0 : i32
    %c0_i32_1 = arith.constant 0 : i32
    return %c0_i32, %c0_i32_0 : i32, i32
  }
}

</mosaic_0001>

<bundles_post_ra>
// kernel: tpu_custom_call.1
= control target key start
LH: loop header
LB: loop body
LE: loop exit
PB: predicated region body
PF: predicated region fallthrough
CT: control target
= control target key end

     0   :  { %14 = vsyncpa [#allocation3], 0  ;;  %s2164_s0 = inlined_call_operand.hbm [shape: f32[128,128], index: 0, kind: input, shape index: {}]   ;;  %s2165_s1 = inlined_call_operand.hbm [shape: f32[128,128], index: 1, kind: input, shape index: {}]   ;;  %s2166_s2 = inlined_call_operand.hbm [shape: f32[128,128], index: 2, kind: input, shape index: {}]   ;;  %s2167_s3 = inlined_call_operand.vmem [shape: f32[1,128], index: 3, kind: input, shape index: {}]   ;;  %s2168_s4 = inlined_call_operand.vmem [shape: f32[1,128], index: 4, kind: input, shape index: {}]   ;;  %s2169_s5 = inlined_call_operand.vmem [shape: f32[1,128], index: 5, kind: input, shape index: {}]   ;;  %s2170_s6 = inlined_call_operand.hbm [shape: f32[128,128], index: 6, kind: output, shape index: {0}]   ;;  %s2171_s7 = inlined_call_operand.hbm [shape: f32[1,128], index: 7, kind: output, shape index: {1}]   ;;  %s2172_s8 = inlined_call_operand.hbm [shape: f32[1,1], index: 8, kind: output, shape index: {2}]  }
   0x1   :  { %15 = vsyncpa [#allocation6], 0 }
   0x2   :  { %16 = vsyncpa [#allocation4], 0 }
   0x3   :  { %17 = vsyncpa [#allocation10], 0  ;;  %s1326_s27 = smov [#allocation5]   ;;  %s1327_s29 = smov [#allocation2]  }
   0x4   :  { %s35_s28 = sshll.u32 %s1326_s27, 4  ;;  %s23_s30 = sshll.u32 %s1327_s29, 4  ;;  %s36_s28 = int_to_ptr.vmem [resolvable:$true] %s35_s28  ;;  %s24_s30 = int_to_ptr.vmem [resolvable:$true] %s23_s30 }
   0x5   :  { %s1206_s9 = scalar_lea.vmem %s36_s28, 2048  ;;  %p1211_p1 = scmp.lt.s32.totalorder %s36_s28, %s36_s28 }
   0x6   :  { %p1207_p0 = scmp.ne.s32.totalorder %s36_s28, %s1206_s9  ;;  %p1212_p2 = scmp.lt.s32.totalorder %s1206_s9, %s1206_s9 }
   0x8   :  { %p1213_p3 = por %p1212_p2, %p1211_p1 }
   0xa   :  { %p1214_p4 = pnand %p1213_p3, %p1207_p0 }
   0xc   :  { %1217 = shalt.err (!%p1214_p4)
}
   0xd   :  { %s1328_s10 = smov 128   ;;  %s1329_s11 = smov 8  }
   0xe   :  { %41 = dma.hbm_to_vmem [thread:$0]  %s2165_s1, 2048, %s36_s28, [#allocation6], %s1328_s10, %s1328_s10, %s1329_s11  }
   0xf   :  { %s1226_s14 = scalar_lea.vmem %s24_s30, 2048  ;;  %p1231_p6 = scmp.lt.s32.totalorder %s24_s30, %s24_s30 }
  0x10   :  { %p1227_p5 = scmp.ne.s32.totalorder %s24_s30, %s1226_s14  ;;  %p1232_p7 = scmp.lt.s32.totalorder %s1226_s14, %s1226_s14 }
  0x12   :  { %p1233_p8 = por %p1232_p7, %p1231_p6 }
  0x14   :  { %p1234_p9 = pnand %p1233_p8, %p1227_p5 }
  0x16   :  { %1237 = shalt.err (!%p1234_p9)
}
  0x17   :  { %29 = dma.hbm_to_vmem [thread:$0]  %s2164_s0, 2048, %s24_s30, [#allocation3], %s1328_s10, %s1328_s10, %s1329_s11  }
  0x18   :  { %s1330_s17 = smov [#allocation7]  }
  0x19   :  { %s47_s18 = sshll.u32 %s1330_s17, 4  ;;  %s48_s18 = int_to_ptr.vmem [resolvable:$true] %s47_s18 }
  0x1a   :  { %s1246_s19 = scalar_lea.vmem %s48_s18, 2048  ;;  %p1251_p11 = scmp.lt.s32.totalorder %s48_s18, %s48_s18 }
  0x1b   :  { %p1247_p10 = scmp.ne.s32.totalorder %s48_s18, %s1246_s19  ;;  %p1252_p12 = scmp.lt.s32.totalorder %s1246_s19, %s1246_s19 }
  0x1d   :  { %p1253_p13 = por %p1252_p12, %p1251_p11 }
  0x1f   :  { %p1254_p0 = pnand %p1253_p13, %p1247_p10 }
  0x21   :  { %1257 = shalt.err (!%p1254_p0)
}
  0x22   :  { %53 = dma.hbm_to_vmem [thread:$0]  %s2166_s2, 2048, %s48_s18, [#allocation6], %s1328_s10, %s1328_s10, %s1329_s11  }
  0x23   :  { %1318 = dma.done.wait [#allocation3], 2048  }
  0x24   :  { %1319 = vsyncadd [#allocation3], 4294965248 }
  0x25   :  { %1320 = dma.done.wait [#allocation6], 4096  }
  0x26   :  { %1321 = vsyncadd [#allocation6], 4294963200  ;;  %v1397_v0 = vld [vmem:[#allocation5] sm:$0xff]  ;;  %v1399_v1 = vld [vmem:[#allocation5 + $0x8] sm:$0xff]  ;;  %v716_v32 = vlaneseq  ;;  %s1331_s22 = smov [#allocation8]  }
  0x27   :  { %v1401_v2 = vld [vmem:[#allocation5 + $0x10] sm:$0xff]  ;;  %v1403_v3 = vld [vmem:[#allocation5 + $0x18] sm:$0xff]  ;;  %v119_v4 = vmin.f32 %v1397_v0, 20.0  ;;  %v1406_v5 = vld [vmem:[#allocation5 + $0x20] sm:$0xff]  ;;  %v120_v8 = vmin.f32 %v1399_v1, 20.0  ;;  %vm103_vm0 = vcmp.gt.f32.partialorder %v1397_v0, 20.0 }
  0x28   :  { %v1408_v6 = vld [vmem:[#allocation5 + $0x28] sm:$0xff]  ;;  %v1410_v7 = vld [vmem:[#allocation5 + $0x30] sm:$0xff]  ;;  %v121_v9 = vmin.f32 %v1401_v2, 20.0  ;;  %v122_v10 = vmin.f32 %v1403_v3, 20.0  ;;  %v123_v11 = vmin.f32 %v1406_v5, 20.0  ;;  %v1416_v12 = vld [vmem:[#allocation5 + $0x38] sm:$0xff] }
  0x29   :  { %v124_v13 = vmin.f32 %v1408_v6, 20.0  ;;  %v125_v14 = vmin.f32 %v1410_v7, 20.0  ;;  %v135_v15 = vmul.f32 1.442695, %v119_v4  ;;  %v137_v16 = vmul.f32 1.442695, %v120_v8 }
  0x2a   :  { %v139_v17 = vmul.f32 1.442695, %v121_v9  ;;  %v141_v18 = vmul.f32 1.442695, %v122_v10  ;;  %v143_v19 = vmul.f32 1.442695, %v123_v11 }
  0x2b   :  { %1035 = vpow2.f32 %v135_v15  ;;  %v126_v20 = vmin.f32 %v1416_v12, 20.0  ;;  %v1424_v21 = vld [vmem:[%s2168_s4] sm:$0x1]  ;;  %v145_v22 = vmul.f32 1.442695, %v124_v13  ;;  %v70_v37 = vld [vmem:[#allocation2 + $0x8] sm:$0xff] }
  0x2c   :  { %1037 = vpow2.f32 %v137_v16  ;;  %v147_v23 = vmul.f32 1.442695, %v125_v14  ;;  %v328_v24 = vmin.f32 %v1424_v21, 20.0  ;;  %v69_v34 = vld [vmem:[#allocation2] sm:$0xff]  ;;  %v71_v38 = vld [vmem:[#allocation2 + $0x10] sm:$0xff]  ;;  %v72_v39 = vld [vmem:[#allocation2 + $0x18] sm:$0xff]  ;;  %v1441_v49 = vmul.f32 %v70_v37, %v70_v37 }
  0x2d   :  { %1039 = vpow2.f32 %v139_v17  ;;  %v149_v25 = vmul.f32 1.442695, %v126_v20  ;;  %v1434_v42 = vand.u32 127, %v716_v32  ;;  %v1436_v43 = vmul.f32 %v69_v34, %v69_v34  ;;  %s966_s23 = sshll.u32 %s1331_s22, 4  ;;  %s967_s23 = int_to_ptr.vmem [resolvable:$true] %s966_s23 }
  0x2e   :  { %1041 = vpow2.f32 %v141_v18  ;;  %v329_v26 = vmul.f32 1.442695, %v328_v24  ;;  %v1443_v50 = vmul.f32 %v71_v38, %v71_v38  ;;  %v1445_v51 = vmul.f32 %v72_v39, %v72_v39  ;;  %s1258_s24 = scalar_lea.vmem %s967_s23, 2048  ;;  %p1263_p2 = scmp.lt.s32.totalorder %s967_s23, %s967_s23 }
  0x2f   :  { %1043 = vpow2.f32 %v143_v19  ;;  %vm104_vm1 = vcmp.gt.f32.partialorder %v1399_v1, 20.0  ;;  %vm105_vm2 = vcmp.gt.f32.partialorder %v1401_v2, 20.0  ;;  %vm106_vm3 = vcmp.gt.f32.partialorder %v1403_v3, 20.0  ;;  %p1259_p1 = scmp.ne.s32.totalorder %s967_s23, %s1258_s24  ;;  %p1264_p3 = scmp.lt.s32.totalorder %s1258_s24, %s1258_s24 }
  0x30   :  { %1045 = vpow2.f32 %v145_v22  ;;  %vm107_vm5 = vcmp.gt.f32.partialorder %v1406_v5, 20.0  ;;  %vm108_vm8 = vcmp.gt.f32.partialorder %v1408_v6, 20.0  ;;  %vm109_vm11 = vcmp.gt.f32.partialorder %v1410_v7, 20.0 }
  0x31   :  { %1047 = vpow2.f32 %v147_v23  ;;  %vm110_vm12 = vcmp.gt.f32.partialorder %v1416_v12, 20.0  ;;  %p1265_p4 = por %p1264_p3, %p1263_p2 }
  0x32   :  { %1049 = vpow2.f32 %v149_v25 }
  0x33   :  { %1051 = vpow2.f32 %v329_v26  ;;  %p1266_p5 = pnand %p1265_p4, %p1259_p1 }
  0x38   :  { %v1036_v27 = vpop.eup %1035 }
  0x39   :  { %v1038_v28 = vpop.eup %1037  ;;  %v167_v29 = vadd.f32 1.0, %v1036_v27  ;;  %v170_v45 = vmul.f32 -0.5, %v1036_v27  ;;  %v173_v55 = vand.u32 2147483647, %v1036_v27 }
  0x3a   :  { %v1040_v30 = vpop.eup %1039  ;;  %v176_v31 = vadd.f32 1.0, %v1038_v28  ;;  %v179_v46 = vmul.f32 -0.5, %v1038_v28  ;;  %v182_v61 = vand.u32 2147483647, %v1038_v28 }
  0x3b   :  { %v1427_v33 = vpop.eup %1041  ;;  %1053 = vlog2.f32 %v167_v29  ;;  %v185_v35 = vadd.f32 1.0, %v1040_v30  ;;  %v188_v48 = vmul.f32 -0.5, %v1040_v30  ;;  %v171_v59 = vadd.f32 1.0, %v170_v45 }
  0x3c   :  { %v1429_v36 = vpop.eup %1043  ;;  %1055 = vlog2.f32 %v176_v31  ;;  %v194_v40 = vadd.f32 1.0, %v1427_v33  ;;  %v197_v53 = vmul.f32 -0.5, %v1427_v33  ;;  %v180_v60 = vadd.f32 1.0, %v179_v46 }
  0x3d   :  { %1057 = vlog2.f32 %v185_v35  ;;  %v1432_v41 = vpop.eup %1045  ;;  %v203_v47 = vadd.f32 1.0, %v1429_v36  ;;  %v206_v56 = vmul.f32 -0.5, %v1429_v36  ;;  %v189_v62 = vadd.f32 1.0, %v188_v48 }
  0x3e   :  { %v1438_v44 = vpop.eup %1047  ;;  %1059 = vlog2.f32 %v194_v40  ;;  %v212_v54 = vadd.f32 1.0, %v1432_v41  ;;  %v191_v63 = vand.u32 2147483647, %v1040_v30  ;;  %v198_v8 = vadd.f32 1.0, %v197_v53 }
  0x3f   :  { %v1447_v52 = vpop.eup %1049  ;;  %1061 = vlog2.f32 %v203_v47  ;;  %v221_v57 = vadd.f32 1.0, %v1438_v44  ;;  %v200_v9 = vand.u32 2147483647, %v1427_v33  ;;  %v209_v10 = vand.u32 2147483647, %v1429_v36 }
  0x40   :  { %v1455_v58 = vpop.eup %1051  ;;  %1063 = vlog2.f32 %v212_v54  ;;  %v230_v4 = vadd.f32 1.0, %v1447_v52  ;;  %vm1462_vm4 = vcmp.lt.f32.partialorder %v173_v55, 0.0004427343  ;;  %v207_v13 = vadd.f32 1.0, %v206_v56 }
  0x41   :  { %1065 = vlog2.f32 %v221_v57  ;;  %v331_v14 = vadd.f32 1.0, %v1455_v58  ;;  %v172_v15 = vmul.f32 %v1036_v27, %v171_v59  ;;  %v181_v16 = vmul.f32 %v1038_v28, %v180_v60  ;;  %v75_v27 = vld [vmem:[#allocation2 + $0x30] sm:$0xff] }
  0x42   :  { %1067 = vlog2.f32 %v230_v4  ;;  %vm1468_vm6 = vcmp.lt.f32.partialorder %v182_v61, 0.0004427343  ;;  %v215_v18 = vmul.f32 -0.5, %v1432_v41  ;;  %v190_v20 = vmul.f32 %v1040_v30, %v189_v62 }
  0x43   :  { %vm1473_vm7 = vcmp.lt.f32.partialorder %v191_v63, 0.0004427343  ;;  %v224_v23 = vmul.f32 -0.5, %v1438_v44  ;;  %1069 = vlog2.f32 %v331_v14  ;;  %v199_v26 = vmul.f32 %v1427_v33, %v198_v8 }
  0x44   :  { %vm1480_vm9 = vcmp.lt.f32.partialorder %v200_v9, 0.0004427343  ;;  %vm1484_vm10 = vcmp.lt.f32.partialorder %v209_v10, 0.0004427343  ;;  %v208_v31 = vmul.f32 %v1429_v36, %v207_v13  ;;  %v218_v32 = vand.u32 2147483647, %v1432_v41 }
  0x45   :  { %v233_v34 = vmul.f32 -0.5, %v1447_v52  ;;  %v216_v37 = vadd.f32 1.0, %v215_v18  ;;  %v227_v38 = vand.u32 2147483647, %v1438_v44  ;;  %v225_v45 = vadd.f32 1.0, %v224_v23 }
  0x46   :  { %v236_v36 = vand.u32 2147483647, %v1447_v52  ;;  %vm1523_vm13 = vcmp.lt.f32.partialorder %v218_v32, 0.0004427343  ;;  %v337_v17 = vand.u32 2147483647, %v1455_v58 }
  0x47   :  { %v234_v55 = vadd.f32 1.0, %v233_v34  ;;  %vm1528_vm14 = vcmp.lt.f32.partialorder %v227_v38, 0.0004427343  ;;  %v821_v38 = vmul.f32 %v75_v27, %v75_v27 }
  0x48   :  { %v1054_v19 = vpop.eup %1053  ;;  %vm1539_vm15 = vcmp.lt.f32.partialorder %v236_v36, 0.0004427343 }
  0x49   :  { %v1056_v24 = vpop.eup %1055  ;;  %v169_v25 = vmul.f32 0.6931472, %v1054_v19  ;;  %v235_v11 = vmul.f32 %v1447_v52, %v234_v55 }
  0x4a   :  { %v1058_v29 = vpop.eup %1057  ;;  %v178_v30 = vmul.f32 0.6931472, %v1056_v24 }
  0x4b   :  { %v175_v33 = vsel %vm1462_vm4, %v172_v15, %v169_v25  ;;  %v187_v35 = vmul.f32 0.6931472, %v1058_v29  ;;  %v1060_v39 = vpop.eup %1059  ;;  %v74_v25 = vld [vmem:[#allocation2 + $0x28] sm:$0xff]  ;;  %vm946_vm4 = vcmask 1040384  }
  0x4c   :  { %v184_v40 = vsel %vm1468_vm6, %v181_v16, %v178_v30  ;;  %v1502_v46 = vsel %vm103_vm0, %v1397_v0, %v175_v33  ;;  %v196_v48 = vmul.f32 0.6931472, %v1060_v39  ;;  %v1062_v54 = vpop.eup %1061  ;;  %v334_v0 = vmul.f32 -0.5, %v1455_v58 }
  0x4d   :  { %v193_v47 = vsel %vm1473_vm7, %v190_v20, %v187_v35  ;;  %v1509_v53 = vsel %vm104_vm1, %v1399_v1, %v184_v40  ;;  %1071 = vlog2.f32 %v1502_v46  ;;  %v205_v59 = vmul.f32 0.6931472, %v1062_v54  ;;  %v1064_v60 = vpop.eup %1063  ;;  %v76_v35 = vld [vmem:[#allocation2 + $0x38] sm:$0xff] }
  0x4e   :  { %2204 = vst [vmem:[#allocation16_spill] sm:$0xff] %v1509_v53  ;;  %v1515_v56 = vsel %vm105_vm2, %v1401_v2, %v193_v47  ;;  %1073 = vlog2.f32 %v1509_v53  ;;  %v202_v57 = vsel %vm1480_vm9, %v199_v26, %v196_v48  ;;  %v217_v1 = vmul.f32 %v1432_v41, %v216_v37  ;;  %v1066_v4 = vpop.eup %1065 }
  0x4f   :  { %2205 = vst [vmem:[#allocation17_spill] sm:$0xff] %v1515_v56  ;;  %1075 = vlog2.f32 %v1515_v56  ;;  %v226_v2 = vmul.f32 %v1438_v44, %v225_v45  ;;  %v1535_v63 = vsel %vm106_vm3, %v1403_v3, %v202_v57  ;;  %v211_v41 = vsel %vm1484_vm10, %v208_v31, %v205_v59  ;;  %v73_v44 = vld [vmem:[#allocation2 + $0x20] sm:$0xff]  ;;  %v1068_v14 = vpop.eup %1067 }
  0x50   :  { %2210 = vst [vmem:[#allocation18_spill] sm:$0xff] %v1535_v63  ;;  %v214_v8 = vmul.f32 0.6931472, %v1064_v60  ;;  %1077 = vlog2.f32 %v1535_v63  ;;  %v223_v10 = vmul.f32 0.6931472, %v1066_v4  ;;  %v1548_v3 = vsel %vm107_vm5, %v1406_v5, %v211_v41  ;;  %v1070_v20 = vpop.eup %1069 }
  0x51   :  { %2213 = vst [vmem:[#allocation19_spill] sm:$0xff] %v1548_v3  ;;  %v335_v13 = vadd.f32 1.0, %v334_v0  ;;  %1079 = vlog2.f32 %v1548_v3  ;;  %v799_v16 = vmul.f32 %v1502_v46, %v1502_v46  ;;  %v232_v18 = vmul.f32 0.6931472, %v1068_v14 }
  0x52   :  { %v220_v15 = vsel %vm1523_vm13, %v217_v1, %v214_v8  ;;  %v229_v52 = vsel %vm1528_vm14, %v226_v2, %v223_v10  ;;  %v800_v19 = vmul.f32 %v1509_v53, %v1509_v53  ;;  %v801_v23 = vmul.f32 %v1515_v56, %v1515_v56 }
  0x53   :  { %v1561_v5 = vsel %vm108_vm8, %v1408_v6, %v220_v15  ;;  %v1568_v22 = vsel %vm109_vm11, %v1410_v7, %v229_v52  ;;  %v819_v24 = vmul.f32 %v73_v44, %v73_v44  ;;  %v238_v6 = vsel %vm1539_vm15, %v235_v11, %v232_v18 }
  0x54   :  { %2214 = vst [vmem:[#allocation20_spill] sm:$0xff] %v1561_v5  ;;  %2215 = vst [vmem:[#allocation21_spill] sm:$0xff] %v1568_v22  ;;  %1081 = vlog2.f32 %v1561_v5  ;;  %vm327_vm0 = vcmp.gt.f32.partialorder %v1424_v21, 20.0  ;;  %v336_v26 = vmul.f32 %v1455_v58, %v335_v13  ;;  %v1581_v7 = vsel %vm110_vm12, %v1416_v12, %v238_v6 }
  0x55   :  { %1083 = vlog2.f32 %v1568_v22  ;;  %2216 = vst [vmem:[#allocation22_spill] sm:$0xff] %v1581_v7  ;;  %v802_v28 = vmul.f32 %v1535_v63, %v1535_v63  ;;  %v831_v29 = vadd.f32 %v1436_v43, %v799_v16  ;;  %vm1586_vm1 = vcmp.lt.f32.partialorder %v337_v17, 0.0004427343 }
  0x56   :  { %1085 = vlog2.f32 %v1581_v7  ;;  %v803_v58 = vmul.f32 %v1548_v3, %v1548_v3  ;;  %v832_v31 = vadd.f32 %v1441_v49, %v800_v19  ;;  %v333_v32 = vmul.f32 0.6931472, %v1070_v20 }
  0x57   :  { %vm734_vm2 = vcmp.lt.s32.totalorder %v1434_v42, 32  ;;  %v820_v12 = vmul.f32 %v74_v25, %v74_v25  ;;  %v833_v34 = vadd.f32 %v1443_v50, %v801_v23  ;;  %v804_v43 = vmul.f32 %v1561_v5, %v1561_v5 }
  0x58   :  { %v805_v37 = vmul.f32 %v1568_v22, %v1568_v22  ;;  %v339_v39 = vsel %vm1586_vm1, %v336_v26, %v333_v32  ;;  %v834_v45 = vadd.f32 %v1445_v51, %v802_v28  ;;  %v847_v36 = vmul.f32 0.5, %v831_v29  ;;  %v101_v51 = vld [vmem:[%s2167_s3] sm:$0x1] }
  0x59   :  { %v1606_v50 = vsel %vm327_vm0, %v1424_v21, %v339_v39  ;;  %v835_v54 = vadd.f32 %v819_v24, %v803_v58  ;;  %v848_v55 = vmul.f32 0.5, %v832_v31  ;;  %v822_v59 = vmul.f32 %v76_v35, %v76_v35 }
  0x5a   :  { %v1072_v33 = vpop.eup %1071  ;;  %2219 = vst [vmem:[#allocation23_spill] sm:$0xff] %v1606_v50  ;;  %1087 = vlog2.f32 %v1606_v50  ;;  %v849_v1 = vmul.f32 0.5, %v833_v34  ;;  %v806_v21 = vmul.f32 %v1581_v7, %v1581_v7  ;;  %v836_v2 = vadd.f32 %v820_v12, %v804_v43 }
  0x5b   :  { %v1074_v40 = vpop.eup %1073  ;;  %v752_v49 = vmul.f32 0.6931472, %v1072_v33  ;;  %v837_v62 = vadd.f32 %v821_v38, %v805_v37  ;;  %v850_v8 = vmul.f32 0.5, %v834_v45  ;;  %v851_v10 = vmul.f32 0.5, %v835_v54 }
  0x5c   :  { %v1076_v47 = vpop.eup %1075  ;;  %v754_v48 = vmul.f32 0.6931472, %v1074_v40  ;;  %v939_v13 = vmul.f32 %v1606_v50, %v1606_v50  ;;  %v940_v14 = vmul.f32 %v101_v51, %v101_v51  ;;  %v838_v19 = vadd.f32 %v822_v59, %v806_v21 }
  0x5d   :  { %v756_v0 = vmul.f32 0.6931472, %v1076_v47  ;;  %v783_v57 = vsub.f32 0.0, %v752_v49  ;;  %v1078_v60 = vpop.eup %1077  ;;  %v852_v20 = vmul.f32 0.5, %v836_v2  ;;  %v853_v23 = vmul.f32 0.5, %v837_v62 }
  0x5e   :  { %v784_v61 = vsub.f32 0.0, %v754_v48  ;;  %v758_v4 = vmul.f32 0.6931472, %v1078_v60  ;;  %v1080_v44 = vpop.eup %1079  ;;  %v941_v31 = vadd.f32 %v940_v14, %v939_v13  ;;  %v854_v38 = vmul.f32 0.5, %v838_v19 }
  0x5f   :  { %v785_v41 = vsub.f32 0.0, %v756_v0  ;;  %v863_v9 = vadd.f32 %v847_v36, %v783_v57  ;;  %v760_v15 = vmul.f32 0.6931472, %v1080_v44  ;;  %v1636_v44 = vld [vmem:[#allocation5 + $0x58] sm:$0xff]  ;;  %vm935_vm3 = vcmp.lt.s32.totalorder %v1434_v42, 64 }
  0x60   :  { %v864_v11 = vadd.f32 %v848_v55, %v784_v61  ;;  %v786_v16 = vsub.f32 0.0, %v758_v4  ;;  %v942_v57 = vmul.f32 0.5, %v941_v31  ;;  %v1628_v4 = vld [vmem:[#allocation5 + $0x40] sm:$0xff]  ;;  %v1653_v42 = vld [vmem:[#allocation5 + $0x78] sm:$0xff]  ;;  %vm114_vm10 = vcmp.gt.f32.partialorder %v1636_v44, 20.0 }
  0x61   :  { %v865_v17 = vadd.f32 %v849_v1, %v785_v41  ;;  %v1006_v52 = vadd.f32 -0.5, %v863_v9  ;;  %v1082_v18 = vpop.eup %1081  ;;  %v787_v26 = vsub.f32 0.0, %v760_v15  ;;  %v1630_v41 = vld [vmem:[#allocation5 + $0x48] sm:$0xff]  ;;  %vm111_vm5 = vcmp.gt.f32.partialorder %v1628_v4, 20.0 }
  0x62   :  { %v1007_v24 = vadd.f32 -0.5, %v864_v11  ;;  %v1084_v25 = vpop.eup %1083  ;;  %v762_v6 = vmul.f32 0.6931472, %v1082_v18  ;;  %v866_v27 = vadd.f32 %v850_v8, %v786_v16  ;;  %v1632_v8 = vld [vmem:[#allocation5 + $0x50] sm:$0xff]  ;;  %v127_v11 = vmin.f32 %v1628_v4, 20.0 }
  0x63   :  { %v1008_v28 = vadd.f32 -0.5, %v865_v17  ;;  %v764_v29 = vmul.f32 0.6931472, %v1084_v25  ;;  %v895_v30 = vsel %vm734_vm2, %v1006_v52, 0.0  ;;  %v1086_v32 = vpop.eup %1085  ;;  %v867_v34 = vadd.f32 %v851_v10, %v787_v26  ;;  %v1638_v10 = vld [vmem:[#allocation5 + $0x60] sm:$0xff]  ;;  %v1646_v52 = vld [vmem:[#allocation5 + $0x68] sm:$0xff] }
  0x64   :  { %v896_v58 = vsel %vm734_vm2, %v1007_v24, 0.0  ;;  %v788_v12 = vsub.f32 0.0, %v762_v6  ;;  %v1009_v33 = vadd.f32 -0.5, %v866_v27  ;;  %v766_v43 = vmul.f32 0.6931472, %v1086_v32  ;;  %v1650_v6 = vld [vmem:[#allocation5 + $0x70] sm:$0xff] }
  0x65   :  { %v897_v35 = vsel %vm734_vm2, %v1008_v28, 0.0  ;;  %v789_v37 = vsub.f32 0.0, %v764_v29  ;;  %v911_v39 = vadd.f32 %v896_v58, %v895_v30  ;;  %v1010_v49 = vadd.f32 -0.5, %v867_v34 }
  0x66   :  { %v868_v40 = vadd.f32 %v852_v20, %v788_v12  ;;  %v898_v45 = vsel %vm734_vm2, %v1009_v33, 0.0  ;;  %v790_v36 = vsub.f32 0.0, %v766_v43  ;;  %v128_v13 = vmin.f32 %v1630_v41, 20.0 }
  0x67   :  { %v869_v47 = vadd.f32 %v853_v23, %v789_v37  ;;  %v912_v48 = vadd.f32 %v911_v39, %v897_v35  ;;  %v1088_v54 = vpop.eup %1087  ;;  %v899_v0 = vsel %vm734_vm2, %v1010_v49, 0.0  ;;  %v129_v14 = vmin.f32 %v1632_v8, 20.0 }
  0x68   :  { %v1011_v55 = vadd.f32 -0.5, %v868_v40  ;;  %v870_v59 = vadd.f32 %v854_v38, %v790_v36  ;;  %v937_v60 = vmul.f32 0.6931472, %v1088_v54  ;;  %v130_v18 = vmin.f32 %v1636_v44, 20.0 }
  0x69   :  { %v1012_v1 = vadd.f32 -0.5, %v869_v47  ;;  %v913_v51 = vadd.f32 %v912_v48, %v898_v45  ;;  %v131_v19 = vmin.f32 %v1638_v10, 20.0  ;;  %v151_v24 = vmul.f32 1.442695, %v127_v11 }
  0x6a   :  { %v900_v61 = vsel %vm734_vm2, %v1011_v55, 0.0  ;;  %v1013_v21 = vadd.f32 -0.5, %v870_v59  ;;  %v938_v62 = vsub.f32 0.0, %v937_v60  ;;  %v153_v25 = vmul.f32 1.442695, %v128_v13 }
  0x6b   :  { %v914_v2 = vadd.f32 %v913_v51, %v899_v0  ;;  %v901_v9 = vsel %vm734_vm2, %v1012_v1, 0.0  ;;  %v155_v26 = vmul.f32 1.442695, %v129_v14  ;;  %v132_v29 = vmin.f32 %v1646_v52, 20.0 }
  0x6c   :  { %v943_v16 = vadd.f32 %v942_v57, %v938_v62  ;;  %v902_v17 = vsel %vm734_vm2, %v1013_v21, 0.0  ;;  %1089 = vpow2.f32 %v151_v24  ;;  %v157_v30 = vmul.f32 1.442695, %v130_v18 }
  0x6d   :  { %v915_v15 = vadd.f32 %v914_v2, %v900_v61  ;;  %1091 = vpow2.f32 %v153_v25  ;;  %v133_v58 = vmin.f32 %v1650_v6, 20.0  ;;  %v159_v31 = vmul.f32 1.442695, %v131_v19 }
  0x6e   :  { %v1022_v23 = vadd.f32 -0.5, %v943_v16  ;;  %1093 = vpow2.f32 %v155_v26  ;;  %v134_v12 = vmin.f32 %v1653_v42, 20.0  ;;  %v161_v34 = vmul.f32 1.442695, %v132_v29 }
  0x6f   :  { %v916_v20 = vadd.f32 %v915_v15, %v901_v9  ;;  %1095 = vpow2.f32 %v157_v30  ;;  %v163_v33 = vmul.f32 1.442695, %v133_v58  ;;  %vm112_vm7 = vcmp.gt.f32.partialorder %v1630_v41, 20.0 }
  0x70   :  { %v945_v28 = vsel %vm935_vm3, %v1022_v23, 0.0  ;;  %1097 = vpow2.f32 %v159_v31  ;;  %v165_v35 = vmul.f32 1.442695, %v134_v12  ;;  %vm113_vm8 = vcmp.gt.f32.partialorder %v1632_v8, 20.0 }
  0x71   :  { %v917_v27 = vadd.f32 %v916_v20, %v902_v17  ;;  %v947_v32 = vsel %vm946_vm4, %v945_v28, 0.0  ;;  %1099 = vpow2.f32 %v161_v34  ;;  %vm115_vm12 = vcmp.gt.f32.partialorder %v1638_v10, 20.0 }
  0x72   :  { %1101 = vpow2.f32 %v163_v33  ;;  %vm116_vm14 = vcmp.gt.f32.partialorder %v1646_v52, 20.0  ;;  %v1726_v16 = vmul.f32 10.0, %v1535_v63  ;;  %vm117_vm2 = vcmp.gt.f32.partialorder %v1650_v6, 20.0 }
  0x73   :  { %926 = vadd.xlane.f32.xlu0 %v917_v27  ;;  %1103 = vpow2.f32 %v165_v35  ;;  %vm118_vm4 = vcmp.gt.f32.partialorder %v1653_v42, 20.0 }
  0x77   :  { %948 = vadd.xlane.f32.xlu0 %v947_v32 }
  0x79   :  { %v1090_v43 = vpop.eup %1089 }
  0x7a   :  { %v1092_v37 = vpop.eup %1091  ;;  %v239_v38 = vadd.f32 1.0, %v1090_v43  ;;  %v242_v59 = vmul.f32 -0.5, %v1090_v43  ;;  %v245_v51 = vand.u32 2147483647, %v1090_v43 }
  0x7b   :  { %v1094_v39 = vpop.eup %1093  ;;  %v248_v40 = vadd.f32 1.0, %v1092_v37  ;;  %v251_v60 = vmul.f32 -0.5, %v1092_v37  ;;  %v254_v61 = vand.u32 2147483647, %v1092_v37 }
  0x7c   :  { %v1657_v49 = vpop.eup %1095  ;;  %1105 = vlog2.f32 %v239_v38  ;;  %v257_v45 = vadd.f32 1.0, %v1094_v39  ;;  %v260_v21 = vmul.f32 -0.5, %v1094_v39  ;;  %v243_v62 = vadd.f32 1.0, %v242_v59 }
  0x7d   :  { %v1098_v36 = vpop.eup %1097  ;;  %1107 = vlog2.f32 %v248_v40  ;;  %v266_v48 = vadd.f32 1.0, %v1657_v49  ;;  %v269_v9 = vmul.f32 -0.5, %v1657_v49  ;;  %v263_v13 = vand.u32 2147483647, %v1094_v39 }
  0x7e   :  { %1109 = vlog2.f32 %v257_v45  ;;  %v1100_v47 = vpop.eup %1099  ;;  %v275_v54 = vadd.f32 1.0, %v1098_v36  ;;  %v278_v11 = vmul.f32 -0.5, %v1098_v36  ;;  %vm1668_vm6 = vcmp.lt.f32.partialorder %v245_v51, 0.0004427343 }
  0x7f   :  { %v1660_v55 = vpop.eup %1101  ;;  %1111 = vlog2.f32 %v266_v48  ;;  %v284_v0 = vadd.f32 1.0, %v1100_v47  ;;  %v287_v14 = vmul.f32 -0.5, %v1100_v47  ;;  %v252_v17 = vadd.f32 1.0, %v251_v60 }
  0x80   :  { %1113 = vlog2.f32 %v275_v54  ;;  %v1662_v57 = vpop.eup %1103  ;;  %v293_v1 = vadd.f32 1.0, %v1660_v55  ;;  %v296_v18 = vmul.f32 -0.5, %v1660_v55  ;;  %vm1675_vm9 = vcmp.lt.f32.partialorder %v254_v61, 0.0004427343 }
  0x81   :  { %1115 = vlog2.f32 %v284_v0  ;;  %v302_v2 = vadd.f32 1.0, %v1662_v57  ;;  %v261_v23 = vadd.f32 1.0, %v260_v21  ;;  %v272_v24 = vand.u32 2147483647, %v1657_v49 }
  0x82   :  { %1117 = vlog2.f32 %v293_v1  ;;  %v244_v26 = vmul.f32 %v1090_v43, %v243_v62  ;;  %v270_v27 = vadd.f32 1.0, %v269_v9  ;;  %v279_v28 = vadd.f32 1.0, %v278_v11 }
  0x83   :  { %1119 = vlog2.f32 %v302_v2  ;;  %v281_v29 = vand.u32 2147483647, %v1098_v36  ;;  %vm1681_vm11 = vcmp.lt.f32.partialorder %v263_v13, 0.0004427343  ;;  %v288_v58 = vadd.f32 1.0, %v287_v14 }
  0x84   :  { %v290_v31 = vand.u32 2147483647, %v1100_v47  ;;  %v305_v32 = vmul.f32 -0.5, %v1662_v57  ;;  %v253_v34 = vmul.f32 %v1092_v37, %v252_v17  ;;  %v297_v33 = vadd.f32 1.0, %v296_v18 }
  0x85   :  { %v299_v35 = vand.u32 2147483647, %v1660_v55  ;;  %v262_v45 = vmul.f32 %v1094_v39, %v261_v23  ;;  %vm1688_vm13 = vcmp.lt.f32.partialorder %v272_v24, 0.0004427343  ;;  %v271_v59 = vmul.f32 %v1657_v49, %v270_v27 }
  0x86   :  { %v280_v37 = vmul.f32 %v1098_v36, %v279_v28  ;;  %vm1694_vm15 = vcmp.lt.f32.partialorder %v281_v29, 0.0004427343  ;;  %v289_v51 = vmul.f32 %v1100_v47, %v288_v58  ;;  %vm1698_vm0 = vcmp.lt.f32.partialorder %v290_v31, 0.0004427343 }
  0x87   :  { %v306_v39 = vadd.f32 1.0, %v305_v32  ;;  %v308_v61 = vand.u32 2147483647, %v1662_v57  ;;  %v298_v62 = vmul.f32 %v1660_v55, %v297_v33  ;;  %vm1706_vm1 = vcmp.lt.f32.partialorder %v299_v35, 0.0004427343 }
  0x88   :  { %v1711_v36 = vmul.f32 10.0, %v1502_v46  ;;  %v1714_v47 = vmul.f32 10.0, %v1509_v53  ;;  %v1721_v14 = vmul.f32 10.0, %v1515_v56  ;;  %v1729_v17 = vmul.f32 10.0, %v1548_v3 }
  0x89   :  { %v1106_v15 = vpop.eup %1105  ;;  %v307_v18 = vmul.f32 %v1662_v57, %v306_v39  ;;  %vm1733_vm3 = vcmp.lt.f32.partialorder %v308_v61, 0.0004427343  ;;  %v1743_v23 = vmul.f32 10.0, %v1561_v5  ;;  %v1768_v28 = vmul.f32 10.0, %v1581_v7 }
  0x8a   :  { %v1108_v19 = vpop.eup %1107  ;;  %v241_v12 = vmul.f32 0.6931472, %v1106_v15  ;;  %v375_v58 = vmin.f32 %v1721_v14, 20.0  ;;  %v376_v31 = vmin.f32 %v1726_v16, 20.0  ;;  %v377_v32 = vmin.f32 %v1729_v17, 20.0 }
  0x8b   :  { %v1110_v25 = vpop.eup %1109  ;;  %v250_v43 = vmul.f32 0.6931472, %v1108_v19  ;;  %v380_v60 = vmin.f32 %v1768_v28, 20.0 }
  0x8c   :  { %v1112_v38 = vpop.eup %1111  ;;  %v259_v40 = vmul.f32 0.6931472, %v1110_v25  ;;  %v247_v2 = vsel %vm1668_vm6, %v244_v26, %v241_v12  ;;  %v1756_v26 = vmul.f32 10.0, %v1568_v22 }
  0x8d   :  { %v1114_v54 = vpop.eup %1113  ;;  %v268_v0 = vmul.f32 0.6931472, %v1112_v38  ;;  %v256_v9 = vsel %vm1675_vm9, %v253_v34, %v250_v43  ;;  %v1740_v20 = vsel %vm111_vm5, %v1628_v4, %v247_v2  ;;  %v373_v4 = vmin.f32 %v1711_v36, 20.0 }
  0x8e   :  { %v1116_v21 = vpop.eup %1115  ;;  %v265_v11 = vsel %vm1681_vm11, %v262_v45, %v259_v40  ;;  %v277_v13 = vmul.f32 0.6931472, %v1114_v54  ;;  %2236 = vst [vmem:[#allocation24_spill] sm:$0xff] %v1740_v20  ;;  %v1748_v25 = vsel %vm112_vm7, %v1630_v41, %v256_v9  ;;  %v1777_v34 = vmul.f32 10.0, %v1740_v20 }
  0x8f   :  { %v274_v55 = vsel %vm1688_vm13, %v271_v59, %v268_v0  ;;  %v286_v15 = vmul.f32 0.6931472, %v1116_v21  ;;  %v1118_v24 = vpop.eup %1117  ;;  %2237 = vst [vmem:[#allocation25_spill] sm:$0xff] %v1748_v25  ;;  %v1753_v57 = vsel %vm113_vm8, %v1632_v8, %v265_v11  ;;  %v374_v8 = vmin.f32 %v1714_v47, 20.0 }
  0x90   :  { %2238 = vst [vmem:[#allocation26_spill] sm:$0xff] %v1753_v57  ;;  %v283_v27 = vsel %vm1694_vm15, %v280_v37, %v277_v13  ;;  %v1765_v41 = vsel %vm114_vm10, %v1636_v44, %v274_v55  ;;  %v1120_v29 = vpop.eup %1119  ;;  %v295_v12 = vmul.f32 0.6931472, %v1118_v24  ;;  %v1780_v44 = vmul.f32 10.0, %v1748_v25 }
  0x91   :  { %2239 = vst [vmem:[#allocation27_spill] sm:$0xff] %v1765_v41  ;;  %v292_v30 = vsel %vm1698_vm0, %v289_v51, %v286_v15  ;;  %v1783_v33 = vmul.f32 10.0, %v1753_v57  ;;  %v1788_v35 = vsel %vm115_vm12, %v1638_v10, %v283_v27  ;;  %v1791_v38 = vmul.f32 10.0, %v1765_v41 }
  0x92   :  { %2240 = vst [vmem:[#allocation28_spill] sm:$0xff] %v1788_v35  ;;  %v378_v43 = vmin.f32 %v1743_v23, 20.0  ;;  %v389_v40 = vmul.f32 1.442695, %v373_v4  ;;  %v304_v45 = vmul.f32 0.6931472, %v1120_v29  ;;  %v1797_v48 = vsel %vm116_vm14, %v1646_v52, %v292_v30 }
  0x93   :  { %2241 = vst [vmem:[#allocation29_spill] sm:$0xff] %v1797_v48  ;;  %v379_v54 = vmin.f32 %v1756_v26, 20.0  ;;  %v391_v0 = vmul.f32 1.442695, %v374_v8  ;;  %v393_v59 = vmul.f32 1.442695, %v375_v58  ;;  %v301_v1 = vsel %vm1706_vm1, %v298_v62, %v295_v12 }
  0x94   :  { %1121 = vpow2.f32 %v389_v40  ;;  %v395_v37 = vmul.f32 1.442695, %v376_v31  ;;  %v397_v10 = vmul.f32 1.442695, %v377_v32  ;;  %v1803_v51 = vmul.f32 10.0, %v1788_v35 }
  0x95   :  { %1123 = vpow2.f32 %v391_v0  ;;  %v1807_v39 = vmul.f32 10.0, %v1797_v48  ;;  %v381_v52 = vmin.f32 %v1777_v34, 20.0  ;;  %v399_v61 = vmul.f32 1.442695, %v378_v43 }
  0x96   :  { %1125 = vpow2.f32 %v393_v59  ;;  %v310_v21 = vsel %vm1733_vm3, %v307_v18, %v304_v45  ;;  %v382_v2 = vmin.f32 %v1780_v44, 20.0  ;;  %v401_v62 = vmul.f32 1.442695, %v379_v54 }
  0x97   :  { %1127 = vpow2.f32 %v395_v37  ;;  %v1816_v49 = vsel %vm117_vm2, %v1650_v6, %v301_v1  ;;  %v383_v9 = vmin.f32 %v1783_v33, 20.0  ;;  %v384_v11 = vmin.f32 %v1791_v38, 20.0 }
  0x98   :  { %2242 = vst [vmem:[#allocation30_spill] sm:$0xff] %v1816_v49  ;;  %1129 = vpow2.f32 %v397_v10  ;;  %v403_v13 = vmul.f32 1.442695, %v380_v60  ;;  %v1823_v55 = vsel %vm118_vm4, %v1653_v42, %v310_v21  ;;  %v385_v15 = vmin.f32 %v1803_v51, 20.0 }
  0x99   :  { %2243 = vst [vmem:[#allocation31_spill] sm:$0xff] %v1823_v55  ;;  %1131 = vpow2.f32 %v399_v61  ;;  %v405_v18 = vmul.f32 1.442695, %v381_v52  ;;  %v1827_v19 = vmul.f32 10.0, %v1816_v49  ;;  %v386_v6 = vmin.f32 %v1807_v39, 20.0 }
  0x9a   :  { %1133 = vpow2.f32 %v401_v62  ;;  %v407_v24 = vmul.f32 1.442695, %v382_v2  ;;  %v409_v4 = vmul.f32 1.442695, %v383_v9  ;;  %v1831_v27 = vmul.f32 10.0, %v1823_v55 }
  0x9b   :  { %2244 = vst [vmem:[#allocation32_spill] sm:$0xff] %v1827_v19  ;;  %1135 = vpow2.f32 %v403_v13  ;;  %v411_v8 = vmul.f32 1.442695, %v384_v11  ;;  %v413_v42 = vmul.f32 1.442695, %v385_v15  ;;  %v387_v29 = vmin.f32 %v1827_v19, 20.0 }
  0x9c   :  { %2245 = vst [vmem:[#allocation33_spill] sm:$0xff] %v1831_v27  ;;  %1137 = vpow2.f32 %v405_v18  ;;  %v415_v30 = vmul.f32 1.442695, %v386_v6  ;;  %v388_v31 = vmin.f32 %v1831_v27, 20.0  ;;  %v1836_v32 = vmul.f32 10.0, %v1606_v50 }
  0x9d   :  { %1139 = vpow2.f32 %v407_v24  ;;  %v417_v45 = vmul.f32 1.442695, %v387_v29  ;;  %vm357_vm15 = vcmp.gt.f32.partialorder %v1711_v36, 20.0  ;;  %vm358_vm1 = vcmp.gt.f32.partialorder %v1714_v47, 20.0  ;;  %v2284_v36 = vld [vmem:[#allocation18_spill] sm:$0xff] }
  0x9e   :  { %1141 = vpow2.f32 %v409_v4  ;;  %2246 = vst [vmem:[#allocation34_spill] sm:$0xff] %v1836_v32  ;;  %v419_v60 = vmul.f32 1.442695, %v388_v31  ;;  %v648_v61 = vmin.f32 %v1836_v32, 20.0  ;;  %vm359_vm2 = vcmp.gt.f32.partialorder %v1721_v14, 20.0 }
  0x9f   :  { %1143 = vpow2.f32 %v411_v8  ;;  %vm364_vm4 = vcmp.gt.f32.partialorder %v1768_v28, 20.0  ;;  %vm367_vm3 = vcmp.gt.f32.partialorder %v1783_v33, 20.0 }
  0xa0   :  { %1145 = vpow2.f32 %v413_v42  ;;  %v1846_v24 = vmul.f32 1.442695, %v648_v61 }
  0xa1   :  { %v1122_v58 = vpop.eup %1121  ;;  %1147 = vpow2.f32 %v415_v30 }
  0xa2   :  { %v1124_v12 = vpop.eup %1123  ;;  %v421_v43 = vadd.f32 1.0, %v1122_v58  ;;  %v424_v54 = vmul.f32 -0.5, %v1122_v58  ;;  %v427_v9 = vand.u32 2147483647, %v1122_v58  ;;  %2247 = vst [vmem:[#allocation35_spill] sm:$0xff] %v1846_v24 }
  0xa3   :  { %v1126_v40 = vpop.eup %1125  ;;  %v430_v0 = vadd.f32 1.0, %v1124_v12  ;;  %v433_v37 = vmul.f32 -0.5, %v1124_v12  ;;  %v436_v8 = vand.u32 2147483647, %v1124_v12 }
  0xa4   :  { %v1128_v59 = vpop.eup %1127  ;;  %1149 = vlog2.f32 %v421_v43  ;;  %v439_v10 = vadd.f32 1.0, %v1126_v40  ;;  %v442_v52 = vmul.f32 -0.5, %v1126_v40  ;;  %v425_v62 = vadd.f32 1.0, %v424_v54 }
  0xa5   :  { %v1838_v1 = vpop.eup %1129  ;;  %1151 = vlog2.f32 %v430_v0  ;;  %v448_v21 = vadd.f32 1.0, %v1128_v59  ;;  %v434_v13 = vadd.f32 1.0, %v433_v37  ;;  %v451_v15 = vmul.f32 -0.5, %v1128_v59 }
  0xa6   :  { %1153 = vlog2.f32 %v439_v10  ;;  %v1841_v2 = vpop.eup %1131  ;;  %v457_v18 = vadd.f32 1.0, %v1838_v1  ;;  %v443_v6 = vadd.f32 1.0, %v442_v52  ;;  %v460_v42 = vmul.f32 -0.5, %v1838_v1 }
  0xa7   :  { %1155 = vpow2.f32 %v417_v45  ;;  %v1843_v11 = vpop.eup %1133  ;;  %v466_v29 = vadd.f32 1.0, %v1841_v2  ;;  %v1852_v31 = vmul.f32 %v1122_v58, %v425_v62  ;;  %v445_v43 = vand.u32 2147483647, %v1126_v40 }
  0xa8   :  { %1157 = vlog2.f32 %v448_v21  ;;  %v1136_v4 = vpop.eup %1135  ;;  %v469_v45 = vmul.f32 -0.5, %v1841_v2  ;;  %v475_v54 = vadd.f32 1.0, %v1843_v11  ;;  %vm1858_vm5 = vcmp.lt.f32.partialorder %v427_v9, 0.0004427343 }
  0xa9   :  { %1159 = vpow2.f32 %v419_v60  ;;  %v1850_v30 = vpop.eup %1137  ;;  %v1862_v10 = vmul.f32 %v1124_v12, %v434_v13  ;;  %v452_v60 = vadd.f32 1.0, %v451_v15  ;;  %v478_v52 = vmul.f32 -0.5, %v1843_v11 }
  0xaa   :  { %1161 = vlog2.f32 %v457_v18  ;;  %v1856_v0 = vpop.eup %1139  ;;  %v1867_v58 = vmul.f32 %v1126_v40, %v443_v6  ;;  %v454_v21 = vand.u32 2147483647, %v1128_v59  ;;  %v484_v62 = vadd.f32 1.0, %v1136_v4 }
  0xab   :  { %1163 = vlog2.f32 %v466_v29  ;;  %v1865_v61 = vpop.eup %1141  ;;  %vm1871_vm6 = vcmp.lt.f32.partialorder %v436_v8, 0.0004427343  ;;  %v461_v50 = vadd.f32 1.0, %v460_v42  ;;  %v463_v12 = vand.u32 2147483647, %v1838_v1 }
  0xac   :  { %1165 = vlog2.f32 %v475_v54  ;;  %v1869_v18 = vpop.eup %1143  ;;  %v472_v13 = vand.u32 2147483647, %v1841_v2  ;;  %v487_v15 = vmul.f32 -0.5, %v1136_v4  ;;  %vm1879_vm7 = vcmp.lt.f32.partialorder %v445_v43, 0.0004427343 }
  0xad   :  { %v1877_v29 = vpop.eup %1145  ;;  %v470_v6 = vadd.f32 1.0, %v469_v45  ;;  %1167 = vlog2.f32 %v484_v62  ;;  %v493_v54 = vadd.f32 1.0, %v1850_v30  ;;  %v496_v8 = vmul.f32 -0.5, %v1850_v30 }
  0xae   :  { %v1885_v32 = vpop.eup %1147  ;;  %v1887_v42 = vmul.f32 %v1128_v59, %v452_v60  ;;  %v479_v24 = vadd.f32 1.0, %v478_v52  ;;  %v481_v55 = vand.u32 2147483647, %v1843_v11  ;;  %v490_v49 = vand.u32 2147483647, %v1136_v4  ;;  %v2293_v59 = vld [vmem:[#allocation22_spill] sm:$0xff] }
  0xaf   :  { %vm1890_vm8 = vcmp.lt.f32.partialorder %v454_v21, 0.0004427343  ;;  %v488_v35 = vadd.f32 1.0, %v487_v15  ;;  %1169 = vlog2.f32 %v493_v54  ;;  %v497_v45 = vadd.f32 1.0, %v496_v8 }
  0xb0   :  { %v502_v62 = vadd.f32 1.0, %v1856_v0  ;;  %v1896_v57 = vmul.f32 %v1838_v1, %v461_v50  ;;  %vm1898_vm9 = vcmp.lt.f32.partialorder %v463_v12, 0.0004427343  ;;  %vm1902_vm10 = vcmp.lt.f32.partialorder %v472_v13, 0.0004427343 }
  0xb1   :  { %v1150_v48 = vpop.eup %1149  ;;  %v505_v52 = vmul.f32 -0.5, %v1856_v0  ;;  %v1910_v54 = vmul.f32 %v1841_v2, %v470_v6  ;;  %v499_v8 = vand.u32 2147483647, %v1850_v30  ;;  %v1916_v1 = vmul.f32 %v1843_v11, %v479_v24 }
  0xb2   :  { %v1152_v41 = vpop.eup %1151  ;;  %v1907_v15 = vmul.f32 0.6931472, %v1150_v48  ;;  %1171 = vlog2.f32 %v502_v62  ;;  %vm1918_vm11 = vcmp.lt.f32.partialorder %v481_v55, 0.0004427343  ;;  %v508_v13 = vand.u32 2147483647, %v1856_v0 }
  0xb3   :  { %v1154_v21 = vpop.eup %1153  ;;  %v511_v48 = vadd.f32 1.0, %v1865_v61  ;;  %v1924_v20 = vmul.f32 0.6931472, %v1152_v41  ;;  %v1926_v2 = vmul.f32 %v1136_v4, %v488_v35  ;;  %vm1928_vm12 = vcmp.lt.f32.partialorder %v490_v49, 0.0004427343 }
  0xb4   :  { %v1913_v50 = vpop.eup %1155  ;;  %v1933_v11 = vmul.f32 %v1850_v30, %v497_v45  ;;  %v514_v55 = vmul.f32 -0.5, %v1865_v61  ;;  %v1938_v62 = vmul.f32 0.6931472, %v1154_v21  ;;  %v506_v7 = vadd.f32 1.0, %v505_v52 }
  0xb5   :  { %v1158_v25 = vpop.eup %1157  ;;  %1173 = vlog2.f32 %v511_v48  ;;  %v520_v41 = vadd.f32 1.0, %v1869_v18  ;;  %vm1947_vm13 = vcmp.lt.f32.partialorder %v499_v8, 0.0004427343  ;;  %v517_v30 = vand.u32 2147483647, %v1865_v61 }
  0xb6   :  { %v1936_v24 = vpop.eup %1159  ;;  %v1945_v49 = vmul.f32 0.6931472, %v1158_v25  ;;  %v523_v45 = vmul.f32 -0.5, %v1869_v18  ;;  %vm1955_vm14 = vcmp.lt.f32.partialorder %v508_v13, 0.0004427343  ;;  %v515_v48 = vadd.f32 1.0, %v514_v55 }
  0xb7   :  { %v1162_v22 = vpop.eup %1161  ;;  %1175 = vlog2.f32 %v520_v41  ;;  %v529_v35 = vadd.f32 1.0, %v1877_v29  ;;  %v526_v5 = vand.u32 2147483647, %v1869_v18  ;;  %v447_v13 = vsel %vm1879_vm7, %v1867_v58, %v1938_v62 }
  0xb8   :  { %v1953_v52 = vmul.f32 0.6931472, %v1162_v22  ;;  %v1164_v25 = vpop.eup %1163  ;;  %v524_v27 = vadd.f32 1.0, %v523_v45  ;;  %v532_v22 = vmul.f32 -0.5, %v1877_v29  ;;  %v1974_v41 = vmul.f32 %v1856_v0, %v506_v7 }
  0xb9   :  { %v1166_v3 = vpop.eup %1165  ;;  %v1971_v55 = vmul.f32 0.6931472, %v1164_v25  ;;  %1177 = vlog2.f32 %v529_v35  ;;  %vm1978_vm0 = vcmp.lt.f32.partialorder %v517_v30, 0.0004427343  ;;  %v535_v63 = vand.u32 2147483647, %v1877_v29 }
  0xba   :  { %v1976_v8 = vmul.f32 0.6931472, %v1166_v3  ;;  %v533_v19 = vadd.f32 1.0, %v532_v22  ;;  %v538_v56 = vadd.f32 1.0, %v1885_v32  ;;  %v1168_v53 = vpop.eup %1167  ;;  %v456_v3 = vsel %vm1890_vm8, %v1887_v42, %v1945_v49 }
  0xbb   :  { %v465_v7 = vsel %vm1898_vm9, %v1896_v57, %v1953_v52  ;;  %v516_v0 = vmul.f32 %v1865_v61, %v515_v48  ;;  %v541_v58 = vmul.f32 -0.5, %v1885_v32  ;;  %v474_v40 = vsel %vm1902_vm10, %v1910_v54, %v1971_v55  ;;  %v607_v54 = vld [vmem:[#allocation7 + $0x48] sm:$0xff] }
  0xbc   :  { %v486_v43 = vmul.f32 0.6931472, %v1168_v53  ;;  %v2004_v42 = vmul.f32 %v1869_v18, %v524_v27  ;;  %vm2006_vm8 = vcmp.lt.f32.partialorder %v526_v5, 0.0004427343  ;;  %1179 = vlog2.f32 %v538_v56  ;;  %v1170_v57 = vpop.eup %1169 }
  0xbd   :  { %vm363_vm9 = vcmp.gt.f32.partialorder %v1756_v26, 20.0  ;;  %v542_v61 = vadd.f32 1.0, %v541_v58  ;;  %v544_v60 = vand.u32 2147483647, %v1885_v32  ;;  %v547_v53 = vadd.f32 1.0, %v1913_v50 }
  0xbe   :  { %v550_v27 = vmul.f32 -0.5, %v1913_v50  ;;  %v483_v56 = vsel %vm1918_vm11, %v1916_v1, %v1976_v8  ;;  %v495_v5 = vmul.f32 0.6931472, %v1170_v57  ;;  %v2023_v18 = vmul.f32 %v1877_v29, %v533_v19 }
  0xbf   :  { %vm2025_vm7 = vcmp.lt.f32.partialorder %v535_v63, 0.0004427343  ;;  %v556_v62 = vadd.f32 1.0, %v1936_v24  ;;  %v1172_v35 = vpop.eup %1171  ;;  %v492_v49 = vsel %vm1928_vm12, %v1926_v2, %v486_v43  ;;  %1181 = vlog2.f32 %v547_v53  ;;  %v2283_v53 = vld [vmem:[#allocation17_spill] sm:$0xff] }
  0xc0   :  { %v551_v12 = vadd.f32 1.0, %v550_v27  ;;  %v559_v1 = vmul.f32 -0.5, %v1936_v24  ;;  %v504_v30 = vmul.f32 0.6931472, %v1172_v35  ;;  %v2036_v19 = vmul.f32 %v1885_v32, %v542_v61  ;;  %v2286_v27 = vld [vmem:[#allocation32_spill] sm:$0xff] }
  0xc1   :  { %v553_v63 = vand.u32 2147483647, %v1913_v50  ;;  %1183 = vlog2.f32 %v556_v62  ;;  %vm369_vm11 = vcmp.gt.f32.partialorder %v1803_v51, 20.0  ;;  %v501_v29 = vsel %vm1947_vm13, %v1933_v11, %v495_v5  ;;  %v2287_v62 = vld [vmem:[#allocation19_spill] sm:$0xff]  ;;  %v2289_v35 = vld [vmem:[#allocation20_spill] sm:$0xff]  ;;  %v2302_v51 = vld [vmem:[#allocation29_spill] sm:$0xff] }
  0xc2   :  { %vm2043_vm10 = vcmp.lt.f32.partialorder %v544_v60, 0.0004427343  ;;  %v560_v2 = vadd.f32 1.0, %v559_v1  ;;  %v562_v52 = vand.u32 2147483647, %v1936_v24  ;;  %v2276_v32 = vsel %vm1858_vm5, %v1852_v31, %v1907_v15  ;;  %v1174_v25 = vpop.eup %1173  ;;  %v2282_v60 = vld [vmem:[#allocation16_spill] sm:$0xff] }
  0xc3   :  { %v566_v48 = vmul.f32 0.1, %v2276_v32  ;;  %v510_v8 = vsel %vm1955_vm14, %v1974_v41, %v504_v30  ;;  %v2277_v11 = vsel %vm1871_vm6, %v1862_v10, %v1924_v20  ;;  %v568_v22 = vmul.f32 0.1, %v447_v13  ;;  %v2292_v30 = vld [vmem:[#allocation21_spill] sm:$0xff] }
  0xc4   :  { %v567_v4 = vmul.f32 0.1, %v2277_v11  ;;  %v569_v55 = vmul.f32 0.1, %v456_v3  ;;  %v513_v58 = vmul.f32 0.6931472, %v1174_v25  ;;  %v2062_v37 = vmul.f32 %v1913_v50, %v551_v12  ;;  %v1176_v43 = vpop.eup %1175 }
  0xc5   :  { %v2065_v31 = vmul.f32 %v1936_v24, %v560_v2  ;;  %v570_v15 = vmul.f32 0.1, %v465_v7  ;;  %vm370_vm5 = vcmp.gt.f32.partialorder %v1807_v39, 20.0  ;;  %vm2068_vm12 = vcmp.lt.f32.partialorder %v553_v63, 0.0004427343  ;;  %v600_v12 = vld [vmem:[#allocation7 + $0x10] sm:$0xff] }
  0xc6   :  { %v571_v9 = vmul.f32 0.1, %v474_v40  ;;  %v572_v20 = vmul.f32 0.1, %v483_v56  ;;  %v573_v10 = vmul.f32 0.1, %v492_v49  ;;  %v582_v13 = vsel %vm357_vm15, %v1502_v46, %v566_v48  ;;  %v1178_v57 = vpop.eup %1177 }
  0xc7   :  { %v519_v50 = vsel %vm1978_vm0, %v516_v0, %v513_v58  ;;  %v522_v24 = vmul.f32 0.6931472, %v1176_v43  ;;  %vm2077_vm6 = vcmp.lt.f32.partialorder %v562_v52, 0.0004427343  ;;  %v574_v3 = vmul.f32 0.1, %v501_v29 }
  0xc8   :  { %v575_v7 = vmul.f32 0.1, %v510_v8  ;;  %v576_v61 = vmul.f32 0.1, %v519_v50  ;;  %v583_v40 = vsel %vm358_vm1, %v2282_v60, %v567_v4  ;;  %v584_v46 = vsel %vm359_vm2, %v2283_v53, %v568_v22  ;;  %v598_v0 = vld [vmem:[#allocation7] sm:$0xff]  ;;  %v599_v49 = vld [vmem:[#allocation7 + $0x8] sm:$0xff] }
  0xc9   :  { %vm2285_vm13 = vcmp.gt.f32.partialorder %v1726_v16, 20.0  ;;  %vm371_vm14 = vcmp.gt.f32.partialorder %v2286_v27, 20.0  ;;  %v528_v56 = vsel %vm2006_vm8, %v2004_v42, %v522_v24  ;;  %v531_v5 = vmul.f32 0.6931472, %v1178_v57  ;;  %v2291_v16 = vld [vmem:[#allocation33_spill] sm:$0xff]  ;;  %v2294_v29 = vld [vmem:[#allocation24_spill] sm:$0xff]  ;;  %v1180_v32 = vpop.eup %1179 }
  0xca   :  { %v585_v45 = vsel %vm2285_vm13, %v2284_v36, %v569_v55  ;;  %vm2288_vm15 = vcmp.gt.f32.partialorder %v1729_v17, 20.0  ;;  %vm2290_vm0 = vcmp.gt.f32.partialorder %v1743_v23, 20.0  ;;  %vm372_vm1 = vcmp.gt.f32.partialorder %v2291_v16, 20.0  ;;  %v601_v2 = vld [vmem:[#allocation7 + $0x18] sm:$0xff]  ;;  %v602_v23 = vld [vmem:[#allocation7 + $0x20] sm:$0xff]  ;;  %v603_v52 = vld [vmem:[#allocation7 + $0x28] sm:$0xff] }
  0xcb   :  { %v586_v47 = vsel %vm2288_vm15, %v2287_v62, %v570_v15  ;;  %v587_v14 = vsel %vm2290_vm0, %v2289_v35, %v571_v9  ;;  %v577_v1 = vmul.f32 0.1, %v528_v56  ;;  %v588_v63 = vsel %vm363_vm9, %v2292_v30, %v572_v20  ;;  %v2296_v25 = vld [vmem:[#allocation25_spill] sm:$0xff]  ;;  %v2298_v8 = vld [vmem:[#allocation26_spill] sm:$0xff]  ;;  %v2299_v58 = vld [vmem:[#allocation27_spill] sm:$0xff] }
  0xcc   :  { %v589_v42 = vsel %vm364_vm4, %v2293_v59, %v573_v10  ;;  %vm2295_vm2 = vcmp.gt.f32.partialorder %v1777_v34, 20.0  ;;  %v537_v48 = vsel %vm2025_vm7, %v2023_v18, %v531_v5  ;;  %vm2297_vm8 = vcmp.gt.f32.partialorder %v1780_v44, 20.0  ;;  %v604_v11 = vld [vmem:[#allocation7 + $0x30] sm:$0xff]  ;;  %v605_v4 = vld [vmem:[#allocation7 + $0x38] sm:$0xff]  ;;  %v606_v43 = vld [vmem:[#allocation7 + $0x40] sm:$0xff] }
  0xcd   :  { %v590_v17 = vsel %vm2295_vm2, %v2294_v29, %v574_v3  ;;  %v591_v26 = vsel %vm2297_vm8, %v2296_v25, %v575_v7  ;;  %v592_v28 = vsel %vm367_vm3, %v2298_v8, %v576_v61  ;;  %v614_v34 = vmul.f32 %v598_v0, %v582_v13  ;;  %v608_v9 = vld [vmem:[#allocation7 + $0x50] sm:$0xff]  ;;  %v609_v20 = vld [vmem:[#allocation7 + $0x58] sm:$0xff]  ;;  %v610_v44 = vld [vmem:[#allocation7 + $0x60] sm:$0xff]  ;;  %v1182_v3 = vpop.eup %1181 }
  0xce   :  { %v540_v22 = vmul.f32 0.6931472, %v1180_v32  ;;  %v578_v55 = vmul.f32 0.1, %v537_v48  ;;  %vm2300_vm4 = vcmp.gt.f32.partialorder %v1791_v38, 20.0  ;;  %v615_v18 = vmul.f32 %v599_v49, %v583_v40  ;;  %v2301_v7 = vld [vmem:[#allocation28_spill] sm:$0xff]  ;;  %v1184_v60 = vpop.eup %1183 }
  0xcf   :  { %v593_v15 = vsel %vm2300_vm4, %v2299_v58, %v577_v1  ;;  %v616_v10 = vmul.f32 %v600_v12, %v584_v46  ;;  %v617_v50 = vmul.f32 %v601_v2, %v585_v45  ;;  %v618_v24 = vmul.f32 %v602_v23, %v586_v47  ;;  %v611_v36 = vld [vmem:[#allocation7 + $0x68] sm:$0xff]  ;;  %v77_v47 = vld [vmem:[#allocation2 + $0x40] sm:$0xff]  ;;  %v79_v30 = vld [vmem:[#allocation2 + $0x50] sm:$0xff] }
  0xd0   :  { %v619_v33 = vmul.f32 %v603_v52, %v587_v14  ;;  %v546_v13 = vsel %vm2043_vm10, %v2036_v19, %v540_v22  ;;  %v594_v38 = vsel %vm369_vm11, %v2301_v7, %v578_v55  ;;  %v620_v57 = vmul.f32 %v604_v11, %v588_v63  ;;  %v78_v35 = vld [vmem:[#allocation2 + $0x48] sm:$0xff]  ;;  %v1189_v14 = vld [vmem:[#allocation2] sm:$0xff]  ;;  %v80_v63 = vld [vmem:[#allocation2 + $0x58] sm:$0xff] }
  0xd1   :  { %v621_v61 = vmul.f32 %v605_v4, %v589_v42  ;;  %v549_v40 = vmul.f32 0.6931472, %v1182_v3  ;;  %v579_v53 = vmul.f32 0.1, %v546_v13  ;;  %v622_v0 = vmul.f32 %v606_v43, %v590_v17  ;;  %v1190_v12 = vld [vmem:[#allocation2 + $0x8] sm:$0xff]  ;;  %v612_v29 = vld [vmem:[#allocation7 + $0x70] sm:$0xff] }
  0xd2   :  { %v623_v46 = vmul.f32 %v607_v54, %v591_v26  ;;  %v558_v45 = vmul.f32 0.6931472, %v1184_v60  ;;  %v624_v56 = vmul.f32 %v608_v9, %v592_v28  ;;  %v625_v5 = vmul.f32 %v609_v20, %v593_v15  ;;  %v1191_v2 = vld [vmem:[#allocation2 + $0x10] sm:$0xff]  ;;  %v82_v23 = vld [vmem:[#allocation2 + $0x68] sm:$0xff]  ;;  %v613_v39 = vld [vmem:[#allocation7 + $0x78] sm:$0xff] }
  0xd3   :  { %v626_v62 = vmul.f32 %v610_v44, %v594_v38  ;;  %v555_v19 = vsel %vm2068_vm12, %v2062_v37, %v549_v40  ;;  %v595_v6 = vsel %vm370_vm5, %v2302_v51, %v579_v53  ;;  %v630_v49 = vadd.f32 %v1189_v14, %v614_v34  ;;  %v81_v37 = vld [vmem:[#allocation2 + $0x60] sm:$0xff]  ;;  %v1192_v32 = vld [vmem:[#allocation2 + $0x18] sm:$0xff]  ;;  %v1194_v8 = vld [vmem:[#allocation2 + $0x28] sm:$0xff] }
  0xd4   :  { %v631_v1 = vadd.f32 %v1190_v12, %v615_v18  ;;  %v564_v59 = vsel %vm2077_vm6, %v2065_v31, %v558_v45  ;;  %v580_v42 = vmul.f32 0.1, %v555_v19  ;;  %v627_v17 = vmul.f32 %v611_v36, %v595_v6  ;;  %v1193_v25 = vld [vmem:[#allocation2 + $0x20] sm:$0xff]  ;;  %v83_v11 = vld [vmem:[#allocation2 + $0x70] sm:$0xff]  ;;  %v1196_v22 = vld [vmem:[#allocation2 + $0x38] sm:$0xff] }
  0xd5   :  { %v632_v21 = vadd.f32 %v1191_v2, %v616_v10  ;;  %v581_v52 = vmul.f32 0.1, %v564_v59  ;;  %v633_v48 = vadd.f32 %v1192_v32, %v617_v50  ;;  %v634_v26 = vadd.f32 %v1193_v25, %v618_v24  ;;  %v2303_v4 = vld [vmem:[#allocation30_spill] sm:$0xff]  ;;  %v2304_v43 = vld [vmem:[#allocation31_spill] sm:$0xff] }
  0xd6   :  { %v635_v28 = vadd.f32 %v1194_v8, %v619_v33  ;;  %v596_v31 = vsel %vm371_vm14, %v2303_v4, %v580_v42  ;;  %v1195_v41 = vld [vmem:[#allocation2 + $0x30] sm:$0xff]  ;;  %v637_v55 = vadd.f32 %v1196_v22, %v621_v61  ;;  %v638_v58 = vadd.f32 %v622_v0, %v77_v47  ;;  %v84_v15 = vld [vmem:[#allocation2 + $0x78] sm:$0xff] }
  0xd7   :  { %v636_v34 = vadd.f32 %v1195_v41, %v620_v57  ;;  %v597_v54 = vsel %vm372_vm1, %v2304_v43, %v581_v52  ;;  %v628_v18 = vmul.f32 %v612_v29, %v596_v31  ;;  %v639_v9 = vadd.f32 %v623_v46, %v78_v35  ;;  %v2305_v27 = vld [vmem:[#allocation35_spill] sm:$0xff] }
  0xd8   :  { %v640_v20 = vadd.f32 %v624_v56, %v79_v30  ;;  %v629_v44 = vmul.f32 %v613_v39, %v597_v54  ;;  %v641_v10 = vadd.f32 %v625_v5, %v80_v63  ;;  %v642_v50 = vadd.f32 %v626_v62, %v81_v37 }
  0xd9   :  { %v643_v24 = vadd.f32 %v627_v17, %v82_v23  ;;  %v644_v33 = vadd.f32 %v628_v18, %v83_v11  ;;  %1185 = vpow2.f32 %v2305_v27  ;;  %v665_v3 = vmul.f32 %v630_v49, %v630_v49 }
  0xda   :  { %v666_v13 = vmul.f32 %v631_v1, %v631_v1  ;;  %v645_v7 = vadd.f32 %v629_v44, %v84_v15  ;;  %v667_v38 = vmul.f32 %v632_v21, %v632_v21  ;;  %v668_v57 = vmul.f32 %v633_v48, %v633_v48 }
  0xdb   :  { %v669_v61 = vmul.f32 %v634_v26, %v634_v26  ;;  %v670_v16 = vmul.f32 %v635_v28, %v635_v28  ;;  %v671_v60 = vmul.f32 %v636_v34, %v636_v34  ;;  %v672_v40 = vmul.f32 %v637_v55, %v637_v55  ;;  %681 = vst [vmem:[#allocation8] sm:$0xff] %v665_v3 }
  0xdc   :  { %v673_v53 = vmul.f32 %v638_v58, %v638_v58  ;;  %682 = vst [vmem:[#allocation8 + $0x8] sm:$0xff] %v666_v13  ;;  %v674_v36 = vmul.f32 %v639_v9, %v639_v9  ;;  %v675_v0 = vmul.f32 %v640_v20, %v640_v20  ;;  %v676_v46 = vmul.f32 %v641_v10, %v641_v10 }
  0xdd   :  { %v677_v45 = vmul.f32 %v642_v50, %v642_v50  ;;  %683 = vst [vmem:[#allocation8 + $0x10] sm:$0xff] %v667_v38  ;;  %684 = vst [vmem:[#allocation8 + $0x18] sm:$0xff] %v668_v57  ;;  %v678_v56 = vmul.f32 %v643_v24, %v643_v24  ;;  %v679_v5 = vmul.f32 %v644_v33, %v644_v33 }
  0xde   :  { %685 = vst [vmem:[#allocation8 + $0x20] sm:$0xff] %v669_v61  ;;  %v680_v62 = vmul.f32 %v645_v7, %v645_v7  ;;  %686 = vst [vmem:[#allocation8 + $0x28] sm:$0xff] %v670_v16 }
  0xdf   :  { %687 = vst [vmem:[#allocation8 + $0x30] sm:$0xff] %v671_v60  ;;  %688 = vst [vmem:[#allocation8 + $0x38] sm:$0xff] %v672_v40 }
  0xe0   :  { %689 = vst [vmem:[#allocation8 + $0x40] sm:$0xff] %v673_v53  ;;  %690 = vst [vmem:[#allocation8 + $0x48] sm:$0xff] %v674_v36 }
  0xe1   :  { %691 = vst [vmem:[#allocation8 + $0x50] sm:$0xff] %v675_v0  ;;  %692 = vst [vmem:[#allocation8 + $0x58] sm:$0xff] %v676_v46 }
  0xe2   :  { %693 = vst [vmem:[#allocation8 + $0x60] sm:$0xff] %v677_v45  ;;  %694 = vst [vmem:[#allocation8 + $0x68] sm:$0xff] %v678_v56 }
  0xe3   :  { %695 = vst [vmem:[#allocation8 + $0x70] sm:$0xff] %v679_v5  ;;  %696 = vst [vmem:[#allocation8 + $0x78] sm:$0xff] %v680_v62 }
  0xe4   :  { %1269 = shalt.err (!%p1266_p5)
}
  0xe5   :  { %972 = dma.vmem_to_hbm [thread:$0]  %s967_s23, 2048, %s2170_s6, [#allocation4], %s1328_s10, %s1328_s10, %s1329_s11   ;;  %v2306_v21 = vld [vmem:[#allocation34_spill] sm:$0xff]  ;;  %v2307_v48 = vld [vmem:[#allocation23_spill] sm:$0xff] }
  0xe6   :  { %v1186_v47 = vpop.eup %1185  ;;  %vm647_vm7 = vcmp.gt.f32.partialorder %v2306_v21, 20.0  ;;  %v662_v52 = vld [vmem:[%s2169_s5] sm:$0x1]  ;;  %s1332_s28 = smov [#allocation9]  }
  0xe7   :  { %v651_v35 = vadd.f32 1.0, %v1186_v47  ;;  %v654_v19 = vmul.f32 -0.5, %v1186_v47  ;;  %v657_v14 = vand.u32 2147483647, %v1186_v47  ;;  %s979_s29 = sshll.u32 %s1332_s28, 4  ;;  %s980_s29 = int_to_ptr.vmem [resolvable:$true] %s979_s29 }
  0xe8   :  { %v1197_v4 = vld [vmem:[%s2167_s3] sm:$0x1]  ;;  %s1278_s5 = scalar_lea.vmem %s980_s29, 16  ;;  %s1282_s10 = scalar_lea.vmem %s980_s29, 32 }
  0xe9   :  { %1187 = vlog2.f32 %v651_v35  ;;  %v655_v6 = vadd.f32 1.0, %v654_v19  ;;  %vm658_vm3 = vcmp.lt.f32.partialorder %v657_v14, 0.0004427343  ;;  %p1279_p6 = scmp.ne.s32.totalorder %s980_s29, %s1278_s5  ;;  %p1283_p7 = scmp.lt.s32.totalorder %s980_s29, %s980_s29 }
  0xea   :  { %p1284_p8 = scmp.lt.s32.totalorder %s1282_s10, %s1278_s5 }
  0xeb   :  { %v656_v30 = vmul.f32 %v1186_v47, %v655_v6 }
  0xec   :  { %p1285_p9 = por %p1284_p8, %p1283_p7 }
  0xee   :  { %p1286_p10 = pnand %p1285_p9, %p1279_p6 }
  0xf6   :  { %v1188_v63 = vpop.eup %1187 }
  0xf7   :  { %v653_v29 = vmul.f32 0.6931472, %v1188_v63 }
  0xf9   :  { %v659_v37 = vsel %vm658_vm3, %v656_v30, %v653_v29 }
  0xfa   :  { %v660_v23 = vmul.f32 0.1, %v659_v37 }
  0xfc   :  { %v927_v51 = vpop.xlane.xlu0 %926  ;;  %v661_v25 = vsel %vm647_vm7, %v2307_v48, %v660_v23 }
  0xfd   :  { %v928_v49 = vrot.slane %v927_v51, 4  ;;  %v663_v28 = vmul.f32 %v662_v52, %v661_v25 }
  0xff   :  { %v929_v12 = vadd.f32 %v928_v49, %v927_v51  ;;  %v664_v31 = vadd.f32 %v1197_v4, %v663_v28 }
 0x100   :  { %v949_v1 = vpop.xlane.xlu0 %948 }
 0x101   :  { %v930_v59 = vrot.slane %v929_v12, 2  ;;  %v950_v42 = vrot.slane %v949_v1, 4  ;;  %v697_v34 = vmul.f32 %v664_v31, %v664_v31 }
 0x103   :  { %v931_v17 = vadd.f32 %v930_v59, %v929_v12  ;;  %v951_v2 = vadd.f32 %v950_v42, %v949_v1  ;;  %698 = vst [vmem:[#allocation9] sm:$0x1] %v697_v34 }
 0x105   :  { %v932_v39 = vrot.slane %v931_v17, 1  ;;  %v952_v32 = vrot.slane %v951_v2, 2 }
 0x107   :  { %v933_v26 = vadd.f32 %v932_v39, %v931_v17  ;;  %v953_v8 = vadd.f32 %v952_v32, %v951_v2 }
 0x109   :  { %1023 = vpush %v933_v26  ;;  %v954_v11 = vrot.slane %v953_v8, 1 }
 0x10b   :  { %v955_v41 = vadd.f32 %v954_v11, %v953_v8 }
 0x10d   :  { %1025 = vpush %v955_v41 }
 0x10e   :  { %1289 = shalt.err (!%p1286_p10)
}
 0x10f   :  { %982 = dma.vmem_to_hbm [thread:$0]  %s980_s29, 16, %s2171_s7, [#allocation10]   ;;  %vm959_vm9 = vcmask 0  }
 0x110   :  { %s1333_s3 = smov [#allocation11]  }
 0x111   :  { %s989_s14 = sshll.u32 %s1333_s3, 4  ;;  %s990_s14 = int_to_ptr.vmem [resolvable:$true] %s989_s14 }
 0x112   :  { %s1298_s17 = scalar_lea.vmem %s990_s14, 16  ;;  %s1302_s18 = scalar_lea.vmem %s990_s14, 32 }
 0x113   :  { %p1299_p11 = scmp.ne.s32.totalorder %s990_s14, %s1298_s17  ;;  %p1303_p12 = scmp.lt.s32.totalorder %s990_s14, %s990_s14 }
 0x114   :  { %p1304_p13 = scmp.lt.s32.totalorder %s1302_s18, %s1298_s17 }
 0x116   :  { %p1305_p0 = por %p1304_p13, %p1303_p12 }
 0x118   :  { %p1306_p1 = pnand %p1305_p0, %p1299_p11 }
 0x13a   :  { %s1024_s13 = spop %1023 }
 0x13e   :  { %s1026_s15 = spop %1025 }
 0x13f   :  { %s957_s16 = sadd.f32 %s1026_s15, %s1024_s13 }
 0x141   :  { %v958_v22 = vstv %s957_s16 }
 0x142   :  { %960 = vst.msk [vmem:[#allocation11] sm:$0x1] %vm959_vm9, %v958_v22 }
 0x143   :  { %1309 = shalt.err (!%p1306_p1)
}
 0x144   :  { %992 = dma.vmem_to_hbm [thread:$0]  %s990_s14, 16, %s2172_s8, [#allocation10]  }
 0x145   :  { %1322 = dma.done.wait [#allocation4], 2048  }
 0x146   :  { %1323 = vsyncadd [#allocation4], 4294965248 }
 0x147   :  { %1324 = dma.done.wait [#allocation10], 32  }
 0x148   :  { %1325 = vsyncadd [#allocation10], 4294967264 }
 0x149   :  { %1002 = vsyncpa [#allocation3], 1 }
 0x14a   :  { %1003 = vsyncpa [#allocation6], 1 }
 0x14b   :  { %1004 = vsyncpa [#allocation4], 1 }
 0x14c   :  { %1005 = vsyncpa [#allocation10], 1 }

</bundles_post_ra>
